<compile_context>
chip_gen: v7x
topology: tpu7x:2x2x1
jax: 0.10.0
libtpu: 0.0.40
codegen_flags: <defaults>
</compile_context>

<pallas_src>
import functools

import jax
import jax.numpy as jnp
from jax.experimental import pallas as pl
from jax.experimental.pallas import tpu as pltpu

LANE = 128
SUBLANE_BF16 = 16          # bf16 packs 16 sublanes per vreg
MAX_TILE = 512             # large-batch tile cap (training/eval path)


def _round_up(x, m):
    return ((x + m - 1) // m) * m


def _dqn_kernel(x_ref,
                w1_ref, b1_ref,
                w2_ref, b2_ref,
                w3_ref, b3_ref,
                w4_ref, b4_ref,
                o_ref):
    # x: (TB, n_obs) fp32 ; weights: bf16 (in, out_padded) ; biases: (1, out_padded) fp32
    h = x_ref[...].astype(jnp.bfloat16)

    h = jnp.dot(h, w1_ref[...], preferred_element_type=jnp.float32) + b1_ref[...]
    h = jnp.maximum(h, 0.0).astype(jnp.bfloat16)

    h = jnp.dot(h, w2_ref[...], preferred_element_type=jnp.float32) + b2_ref[...]
    h = jnp.maximum(h, 0.0).astype(jnp.bfloat16)

    h = jnp.dot(h, w3_ref[...], preferred_element_type=jnp.float32) + b3_ref[...]
    h = jnp.maximum(h, 0.0).astype(jnp.bfloat16)

    h = jnp.dot(h, w4_ref[...], preferred_element_type=jnp.float32) + b4_ref[...]

    o_ref[...] = h.astype(o_ref.dtype)


@functools.partial(jax.jit, static_argnames=("n_actions",))
def dqn_forward(x, params, n_actions):
    (w1, b1), (w2, b2), (w3, b3), (w4, b4) = params
    batch, n_obs = x.shape
    d4p = w4.shape[1]

    # ---- Batch tiling ------------------------------------------------------
    # Tiny (inference / action-selection) batches: one tile, no batch padding.
    # Larger batches: at least two tiles (lets the "parallel" axis shard across
    # v7x's 2 TensorCores), tile a multiple of 16 sublanes, capped at MAX_TILE.
    if batch <= 2 * SUBLANE_BF16:
        tb = batch
        batch_p = batch
    else:
        tb = min(MAX_TILE, _round_up((batch + 1) // 2, SUBLANE_BF16))
        batch_p = _round_up(batch, tb)
    n_tiles = batch_p // tb

    # Pad batch rows only when the batch does not tile evenly.
    if batch_p != batch:
        x_in = jnp.zeros((batch_p, n_obs), x.dtype).at[:batch, :].set(x)
    else:
        x_in = x

    def resident_spec(shape):
        # Weights/biases: constant block index -> stay VMEM-resident across the
        # grid; single-buffered (no dead second copy).
        return pl.BlockSpec(shape, lambda i: (0, 0), pipeline_mode=pl.Buffered(1))

    out = pl.pallas_call(
        _dqn_kernel,
        out_shape=jax.ShapeDtypeStruct((batch_p, d4p), jnp.float32),
        grid=(n_tiles,),
        in_specs=[
            pl.BlockSpec((tb, n_obs), lambda i: (i, 0)),
            resident_spec(w1.shape), resident_spec(b1.shape),
            resident_spec(w2.shape), resident_spec(b2.shape),
            resident_spec(w3.shape), resident_spec(b3.shape),
            resident_spec(w4.shape), resident_spec(b4.shape),
        ],
        out_specs=pl.BlockSpec((tb, d4p), lambda i: (i, 0)),
        compiler_params=pltpu.CompilerParams(
            dimension_semantics=("parallel",),
            vmem_limit_bytes=32 << 20,
        ),
    )(x_in, w1, b1, w2, b2, w3, b3, w4, b4)

    # Drop padded batch rows (if any) and padded action columns.
    return out[:batch, :n_actions]


def init_dqn_params(key, n_observations, n_actions):
    """nn.Linear-style init (U(-1/sqrt(fan_in), +1/sqrt(fan_in))).

    Weights stored transposed vs. PyTorch, i.e. (in_features, out_features), in
    bfloat16. Output dims are zero-padded to multiples of 128 (lane-dense);
    the fc1 input dim stays at n_observations (full-dim block is legal and
    avoids padding x). Biases stored as (1, padded_out) in fp32.
    """
    dims = [n_observations, 800, 600, 400, n_actions]
    padded_out = [_round_up(d, LANE) for d in dims]
    params = []
    for i in range(4):
        fan_in, fan_out = dims[i], dims[i + 1]
        p_in = n_observations if i == 0 else padded_out[i]
        p_out = padded_out[i + 1]
        key, kw, kb = jax.random.split(key, 3)
        bound = 1.0 / (fan_in ** 0.5)
        w = jax.random.uniform(kw, (fan_in, fan_out), jnp.float32, -bound, bound)
        b = jax.random.uniform(kb, (1, fan_out), jnp.float32, -bound, bound)
        w_p = jnp.zeros((p_in, p_out), jnp.bfloat16)
        w_p = w_p.at[:fan_in, :fan_out].set(w.astype(jnp.bfloat16))
        b_p = jnp.zeros((1, p_out), jnp.float32)
        b_p = b_p.at[:, :fan_out].set(b)
        params.append((w_p, b_p))
    return params


def dqn_reference(x, params, n_actions):
    """fp32 reference using the same (bf16-stored, zero-padded) weights."""
    h = x
    for i, (w, b) in enumerate(params):
        h = h @ w.astype(jnp.float32) + b
        if i < 3:
            h = jnp.maximum(h, 0.0)
    return h[:, :n_actions]


if __name__ == "__main__":
    key = jax.random.PRNGKey(0)
    n_observations = 32
    n_actions = 8
    batch = 2

    key, kx = jax.random.split(key)
    x = jax.random.normal(kx, (batch, n_observations), jnp.float32)
    params = init_dqn_params(key, n_observations, n_actions)

    out = dqn_forward(x, params, n_actions)
    out = jax.block_until_ready(out)

    ref = dqn_reference(x, params, n_actions)
    assert out.shape == (batch, n_actions)
    # bf16 activations between layers -> loosened tolerance vs. fp32 reference.
    assert jnp.allclose(out, ref, atol=5e-2, rtol=5e-2), "mismatch vs JAX reference"

    print("KERNEL_OK")
</pallas_src>

<mosaic_0001>
module attributes {stable_mosaic.version = 11 : i64} {
  func.func @_dqn_kernel(%arg0: i32, %arg1: memref<2x32xf32, #tpu.memory_space<vmem>>, %arg2: memref<32x896xbf16, #tpu.memory_space<vmem>>, %arg3: memref<1x896xf32, #tpu.memory_space<vmem>>, %arg4: memref<896x640xbf16, #tpu.memory_space<vmem>>, %arg5: memref<1x640xf32, #tpu.memory_space<vmem>>, %arg6: memref<640x512xbf16, #tpu.memory_space<vmem>>, %arg7: memref<1x512xf32, #tpu.memory_space<vmem>>, %arg8: memref<512x128xbf16, #tpu.memory_space<vmem>>, %arg9: memref<1x128xf32, #tpu.memory_space<vmem>>, %arg10: memref<2x128xf32, #tpu.memory_space<vmem>>) attributes {dimension_semantics = [#tpu.dimension_semantics<parallel>], iteration_bounds = array<i64: 1>, scalar_prefetch = 0 : i64, scratch_operands = 0 : i64, tpu.core_type = #tpu.core_type<tc>, window_params = [{transform_indices = @transform_0, window_bounds = array<i64: 2, 32>}, {pipeline_mode = #tpu.pipeline_mode<synchronous>, transform_indices = @transform_1, window_bounds = array<i64: 32, 896>}, {pipeline_mode = #tpu.pipeline_mode<synchronous>, transform_indices = @transform_2, window_bounds = array<i64: 1, 896>}, {pipeline_mode = #tpu.pipeline_mode<synchronous>, transform_indices = @transform_3, window_bounds = array<i64: 896, 640>}, {pipeline_mode = #tpu.pipeline_mode<synchronous>, transform_indices = @transform_4, window_bounds = array<i64: 1, 640>}, {pipeline_mode = #tpu.pipeline_mode<synchronous>, transform_indices = @transform_5, window_bounds = array<i64: 640, 512>}, {pipeline_mode = #tpu.pipeline_mode<synchronous>, transform_indices = @transform_6, window_bounds = array<i64: 1, 512>}, {pipeline_mode = #tpu.pipeline_mode<synchronous>, transform_indices = @transform_7, window_bounds = array<i64: 512, 128>}, {pipeline_mode = #tpu.pipeline_mode<synchronous>, transform_indices = @transform_8, window_bounds = array<i64: 1, 128>}, {transform_indices = @transform_9, window_bounds = array<i64: 2, 128>}]} {
    %c0 = arith.constant 0 : index
    %c0_0 = arith.constant 0 : index
    %0 = vector.load %arg1[%c0, %c0_0] : memref<2x32xf32, #tpu.memory_space<vmem>>, vector<2x32xf32>
    %1 = arith.truncf %0 : vector<2x32xf32> to vector<2x32xbf16>
    %c0_1 = arith.constant 0 : index
    %c0_2 = arith.constant 0 : index
    %2 = vector.load %arg2[%c0_1, %c0_2] : memref<32x896xbf16, #tpu.memory_space<vmem>>, vector<32x896xbf16>
    %cst = arith.constant dense<0.000000e+00> : vector<2x896xf32>
    %3 = tpu.matmul %1, %2, %cst {dimension_numbers = #tpu.dot_dimension_numbers<[1], [0], [0], [1], [0, 0, 1, 1], [], []>} : vector<2x32xbf16>, vector<32x896xbf16>, vector<2x896xf32> -> vector<2x896xf32>
    %c0_3 = arith.constant 0 : index
    %c0_4 = arith.constant 0 : index
    %4 = vector.load %arg3[%c0_3, %c0_4] : memref<1x896xf32, #tpu.memory_space<vmem>>, vector<1x896xf32>
    %5 = vector.broadcast %4 : vector<1x896xf32> to vector<2x896xf32>
    %6 = arith.addf %3, %5 : vector<2x896xf32>
    %cst_5 = arith.constant 0.000000e+00 : f32
    %7 = vector.broadcast %cst_5 : f32 to vector<2x896xf32>
    %8 = arith.maximumf %6, %7 : vector<2x896xf32>
    %9 = arith.truncf %8 : vector<2x896xf32> to vector<2x896xbf16>
    %c0_6 = arith.constant 0 : index
    %c0_7 = arith.constant 0 : index
    %10 = vector.load %arg4[%c0_6, %c0_7] : memref<896x640xbf16, #tpu.memory_space<vmem>>, vector<896x640xbf16>
    %cst_8 = arith.constant dense<0.000000e+00> : vector<2x640xf32>
    %11 = tpu.matmul %9, %10, %cst_8 {dimension_numbers = #tpu.dot_dimension_numbers<[1], [0], [0], [1], [0, 0, 1, 1], [], []>} : vector<2x896xbf16>, vector<896x640xbf16>, vector<2x640xf32> -> vector<2x640xf32>
    %c0_9 = arith.constant 0 : index
    %c0_10 = arith.constant 0 : index
    %12 = vector.load %arg5[%c0_9, %c0_10] : memref<1x640xf32, #tpu.memory_space<vmem>>, vector<1x640xf32>
    %13 = vector.broadcast %12 : vector<1x640xf32> to vector<2x640xf32>
    %14 = arith.addf %11, %13 : vector<2x640xf32>
    %cst_11 = arith.constant 0.000000e+00 : f32
    %15 = vector.broadcast %cst_11 : f32 to vector<2x640xf32>
    %16 = arith.maximumf %14, %15 : vector<2x640xf32>
    %17 = arith.truncf %16 : vector<2x640xf32> to vector<2x640xbf16>
    %c0_12 = arith.constant 0 : index
    %c0_13 = arith.constant 0 : index
    %18 = vector.load %arg6[%c0_12, %c0_13] : memref<640x512xbf16, #tpu.memory_space<vmem>>, vector<640x512xbf16>
    %cst_14 = arith.constant dense<0.000000e+00> : vector<2x512xf32>
    %19 = tpu.matmul %17, %18, %cst_14 {dimension_numbers = #tpu.dot_dimension_numbers<[1], [0], [0], [1], [0, 0, 1, 1], [], []>} : vector<2x640xbf16>, vector<640x512xbf16>, vector<2x512xf32> -> vector<2x512xf32>
    %c0_15 = arith.constant 0 : index
    %c0_16 = arith.constant 0 : index
    %20 = vector.load %arg7[%c0_15, %c0_16] : memref<1x512xf32, #tpu.memory_space<vmem>>, vector<1x512xf32>
    %21 = vector.broadcast %20 : vector<1x512xf32> to vector<2x512xf32>
    %22 = arith.addf %19, %21 : vector<2x512xf32>
    %cst_17 = arith.constant 0.000000e+00 : f32
    %23 = vector.broadcast %cst_17 : f32 to vector<2x512xf32>
    %24 = arith.maximumf %22, %23 : vector<2x512xf32>
    %25 = arith.truncf %24 : vector<2x512xf32> to vector<2x512xbf16>
    %c0_18 = arith.constant 0 : index
    %c0_19 = arith.constant 0 : index
    %26 = vector.load %arg8[%c0_18, %c0_19] : memref<512x128xbf16, #tpu.memory_space<vmem>>, vector<512x128xbf16>
    %cst_20 = arith.constant dense<0.000000e+00> : vector<2x128xf32>
    %27 = tpu.matmul %25, %26, %cst_20 {dimension_numbers = #tpu.dot_dimension_numbers<[1], [0], [0], [1], [0, 0, 1, 1], [], []>} : vector<2x512xbf16>, vector<512x128xbf16>, vector<2x128xf32> -> vector<2x128xf32>
    %c0_21 = arith.constant 0 : index
    %c0_22 = arith.constant 0 : index
    %28 = vector.load %arg9[%c0_21, %c0_22] : memref<1x128xf32, #tpu.memory_space<vmem>>, vector<1x128xf32>
    %29 = vector.broadcast %28 : vector<1x128xf32> to vector<2x128xf32>
    %30 = arith.addf %27, %29 : vector<2x128xf32>
    %c0_23 = arith.constant 0 : index
    %c0_24 = arith.constant 0 : index
    %31 = vector.load %arg10[%c0_23, %c0_24] : memref<2x128xf32, #tpu.memory_space<vmem>>, vector<2x128xf32>
    tpu.vector_store %arg10[%c0_23, %c0_24], %30 {strides = array<i32>} : memref<2x128xf32, #tpu.memory_space<vmem>>, vector<2x128xf32>,
    return
  }
  func.func @transform_0(%arg0: i32) -> (i32, i32) {
    %c0_i32 = arith.constant 0 : i32
    %c0_i32_0 = arith.constant 0 : i32
    return %arg0, %c0_i32 : i32, i32
  }
  func.func @transform_1(%arg0: i32) -> (i32, i32) {
    %c0_i32 = arith.constant 0 : i32
    %c0_i32_0 = arith.constant 0 : i32
    %c0_i32_1 = arith.constant 0 : i32
    return %c0_i32, %c0_i32_0 : i32, i32
  }
  func.func @transform_2(%arg0: i32) -> (i32, i32) {
    %c0_i32 = arith.constant 0 : i32
    %c0_i32_0 = arith.constant 0 : i32
    %c0_i32_1 = arith.constant 0 : i32
    return %c0_i32, %c0_i32_0 : i32, i32
  }
  func.func @transform_3(%arg0: i32) -> (i32, i32) {
    %c0_i32 = arith.constant 0 : i32
    %c0_i32_0 = arith.constant 0 : i32
    %c0_i32_1 = arith.constant 0 : i32
    return %c0_i32, %c0_i32_0 : i32, i32
  }
  func.func @transform_4(%arg0: i32) -> (i32, i32) {
    %c0_i32 = arith.constant 0 : i32
    %c0_i32_0 = arith.constant 0 : i32
    %c0_i32_1 = arith.constant 0 : i32
    return %c0_i32, %c0_i32_0 : i32, i32
  }
  func.func @transform_5(%arg0: i32) -> (i32, i32) {
    %c0_i32 = arith.constant 0 : i32
    %c0_i32_0 = arith.constant 0 : i32
    %c0_i32_1 = arith.constant 0 : i32
    return %c0_i32, %c0_i32_0 : i32, i32
  }
  func.func @transform_6(%arg0: i32) -> (i32, i32) {
    %c0_i32 = arith.constant 0 : i32
    %c0_i32_0 = arith.constant 0 : i32
    %c0_i32_1 = arith.constant 0 : i32
    return %c0_i32, %c0_i32_0 : i32, i32
  }
  func.func @transform_7(%arg0: i32) -> (i32, i32) {
    %c0_i32 = arith.constant 0 : i32
    %c0_i32_0 = arith.constant 0 : i32
    %c0_i32_1 = arith.constant 0 : i32
    return %c0_i32, %c0_i32_0 : i32, i32
  }
  func.func @transform_8(%arg0: i32) -> (i32, i32) {
    %c0_i32 = arith.constant 0 : i32
    %c0_i32_0 = arith.constant 0 : i32
    %c0_i32_1 = arith.constant 0 : i32
    return %c0_i32, %c0_i32_0 : i32, i32
  }
  func.func @transform_9(%arg0: i32) -> (i32, i32) {
    %c0_i32 = arith.constant 0 : i32
    %c0_i32_0 = arith.constant 0 : i32
    return %arg0, %c0_i32 : i32, i32
  }
}

</mosaic_0001>

<bundles_post_ra>
// kernel: dqn_forward.1
= control target key start
LH: loop header
LB: loop body
LE: loop exit
PB: predicated region body
PF: predicated region fallthrough
CT: control target
= control target key end

     0   :  { %14 = vsyncpa [#allocation3], 0  ;;  %s6317_s0 = inlined_call_operand.hbm [shape: f32[2,32], index: 0, kind: input, shape index: {}]   ;;  %s6318_s1 = inlined_call_operand.hbm [shape: bf16[32,896], index: 1, kind: input, shape index: {}]   ;;  %s6319_s2 = inlined_call_operand.hbm [shape: f32[1,896], index: 2, kind: input, shape index: {}]   ;;  %s6320_s3 = inlined_call_operand.hbm [shape: bf16[896,640], index: 3, kind: input, shape index: {}]   ;;  %s6321_s4 = inlined_call_operand.hbm [shape: f32[1,640], index: 4, kind: input, shape index: {}]   ;;  %s6322_s5 = inlined_call_operand.hbm [shape: bf16[640,512], index: 5, kind: input, shape index: {}]   ;;  %s6323_s6 = inlined_call_operand.hbm [shape: f32[1,512], index: 6, kind: input, shape index: {}]   ;;  %s6324_s7 = inlined_call_operand.hbm [shape: bf16[512,128], index: 7, kind: input, shape index: {}]   ;;  %s6325_s8 = inlined_call_operand.hbm [shape: f32[1,128], index: 8, kind: input, shape index: {}]   ;;  %s6326_s9 = inlined_call_operand.hbm [shape: f32[2,128], index: 9, kind: output, shape index: {}]  }
   0x1   :  { %15 = vsyncpa [#allocation6], 0 }
   0x2   :  { %16 = vsyncpa [#allocation9], 0 }
   0x3   :  { %17 = vsyncpa [#allocation12], 0 }
   0x4   :  { %18 = vsyncpa [#allocation15], 0 }
   0x5   :  { %19 = vsyncpa [#allocation4], 0  ;;  %s5996_s30 = smov [#allocation5]   ;;  %s5764_s13 = scalar_lea.hbm %s6318_s1, 1792 }
   0x6   :  { %s35_s10 = sshll.u32 %s5996_s30, 4  ;;  %p5765_p0 = scmp.ne.s32.totalorder %s6318_s1, %s5764_s13  ;;  %s36_s10 = int_to_ptr.vmem [resolvable:$true] %s35_s10 }
   0x7   :  { %p5768_p1 = scmp.lt.u32.totalorder %s5764_s13, %s6318_s1 }
   0x9   :  { %p5770_p2 = pnand %p5768_p1, %p5765_p0 }
   0xb   :  { %5773 = shalt.err (!%p5770_p2)
}
   0xc   :  { %s5774_s18 = scalar_lea.vmem %s36_s10, 1792  ;;  %p5779_p4 = scmp.lt.s32.totalorder %s36_s10, %s36_s10 }
   0xd   :  { %p5775_p3 = scmp.ne.s32.totalorder %s36_s10, %s5774_s18  ;;  %p5780_p5 = scmp.lt.s32.totalorder %s5774_s18, %s5774_s18 }
   0xf   :  { %p5781_p6 = por %p5780_p5, %p5779_p4 }
  0x11   :  { %p5782_p7 = pnand %p5781_p6, %p5775_p3 }
  0x13   :  { %5785 = shalt.err (!%p5782_p7)
}
  0x14   :  { %s5997_s19 = smov 448   ;;  %s5998_s20 = smov 28  }
  0x15   :  { %41 = dma.hbm_to_vmem [thread:$0]  %s6318_s1, 1792, %s36_s10, [#allocation6], %s5997_s19, %s5997_s19, %s5998_s20  }
  0x16   :  { %s5999_s23 = smov [#allocation8]   ;;  %s5786_s27 = scalar_lea.hbm %s6320_s3, 35840 }
  0x17   :  { %s57_s24 = sshll.u32 %s5999_s23, 4  ;;  %p5787_p8 = scmp.ne.s32.totalorder %s6320_s3, %s5786_s27  ;;  %s58_s24 = int_to_ptr.vmem [resolvable:$true] %s57_s24 }
  0x18   :  { %p5790_p9 = scmp.lt.u32.totalorder %s5786_s27, %s6320_s3 }
  0x1a   :  { %p5792_p10 = pnand %p5790_p9, %p5787_p8 }
  0x1c   :  { %5795 = shalt.err (!%p5792_p10)
}
  0x1d   :  { %s5796_s12 = scalar_lea.vmem %s58_s24, 35840  ;;  %p5801_p12 = scmp.lt.s32.totalorder %s58_s24, %s58_s24 }
  0x1e   :  { %p5797_p11 = scmp.ne.s32.totalorder %s58_s24, %s5796_s12  ;;  %p5802_p13 = scmp.lt.s32.totalorder %s5796_s12, %s5796_s12 }
  0x20   :  { %p5803_p0 = por %p5802_p13, %p5801_p12 }
  0x22   :  { %p5804_p1 = pnand %p5803_p0, %p5797_p11 }
  0x24   :  { %5807 = shalt.err (!%p5804_p1)
}
  0x25   :  { %s6000_s1 = smov 320   ;;  %s6001_s10 = smov 20  }
  0x26   :  { %63 = dma.hbm_to_vmem [thread:$0]  %s6320_s3, 35840, %s58_s24, [#allocation9], %s6000_s1, %s6000_s1, %s6001_s10  }
  0x27   :  { %s6002_s15 = smov [#allocation11]   ;;  %s5808_s19 = scalar_lea.hbm %s6322_s5, 20480 }
  0x28   :  { %s79_s16 = sshll.u32 %s6002_s15, 4  ;;  %p5809_p2 = scmp.ne.s32.totalorder %s6322_s5, %s5808_s19  ;;  %s80_s16 = int_to_ptr.vmem [resolvable:$true] %s79_s16 }
  0x29   :  { %p5812_p3 = scmp.lt.u32.totalorder %s5808_s19, %s6322_s5 }
  0x2b   :  { %p5814_p4 = pnand %p5812_p3, %p5809_p2 }
  0x2d   :  { %5817 = shalt.err (!%p5814_p4)
}
  0x2e   :  { %s5818_s25 = scalar_lea.vmem %s80_s16, 20480  ;;  %p5823_p6 = scmp.lt.s32.totalorder %s80_s16, %s80_s16 }
  0x2f   :  { %p5819_p5 = scmp.ne.s32.totalorder %s80_s16, %s5818_s25  ;;  %p5824_p7 = scmp.lt.s32.totalorder %s5818_s25, %s5818_s25 }
  0x31   :  { %p5825_p8 = por %p5824_p7, %p5823_p6 }
  0x33   :  { %p5826_p9 = pnand %p5825_p8, %p5819_p5 }
  0x35   :  { %5829 = shalt.err (!%p5826_p9)
}
  0x36   :  { %s6003_s3 = smov 256   ;;  %s6004_s24 = smov 16  }
  0x37   :  { %85 = dma.hbm_to_vmem [thread:$0]  %s6322_s5, 20480, %s80_s16, [#allocation12], %s6003_s3, %s6003_s3, %s6004_s24  }
  0x38   :  { %s6005_s28 = smov [#allocation14]   ;;  %s5830_s12 = scalar_lea.hbm %s6324_s7, 4096 }
  0x39   :  { %s101_s29 = sshll.u32 %s6005_s28, 4  ;;  %p5831_p10 = scmp.ne.s32.totalorder %s6324_s7, %s5830_s12  ;;  %s102_s29 = int_to_ptr.vmem [resolvable:$true] %s101_s29 }
  0x3a   :  { %p5834_p11 = scmp.lt.u32.totalorder %s5830_s12, %s6324_s7 }
  0x3c   :  { %p5836_p12 = pnand %p5834_p11, %p5831_p10 }
  0x3e   :  { %5839 = shalt.err (!%p5836_p12)
}
  0x3f   :  { %s5840_s15 = scalar_lea.vmem %s102_s29, 4096  ;;  %p5845_p0 = scmp.lt.s32.totalorder %s102_s29, %s102_s29 }
  0x40   :  { %p5841_p13 = scmp.ne.s32.totalorder %s102_s29, %s5840_s15  ;;  %p5846_p1 = scmp.lt.s32.totalorder %s5840_s15, %s5840_s15 }
  0x42   :  { %p5847_p2 = por %p5846_p1, %p5845_p0 }
  0x44   :  { %p5848_p3 = pnand %p5847_p2, %p5841_p13 }
  0x46   :  { %5851 = shalt.err (!%p5848_p3)
}
  0x47   :  { %s6006_s5 = smov 64   ;;  %s6007_s16 = smov 4  }
  0x48   :  { %107 = dma.hbm_to_vmem [thread:$0]  %s6324_s7, 4096, %s102_s29, [#allocation15], %s6006_s5, %s6006_s5, %s6007_s16  }
  0x49   :  { %s6008_s19 = smov [#allocation2]   ;;  %s6009_s21 = smov [#allocation7]  }
  0x4a   :  { %s26_s20 = sshll.u32 %s6008_s19, 4  ;;  %s48_s22 = sshll.u32 %s6009_s21, 4  ;;  %s27_s20 = int_to_ptr.vmem [resolvable:$true] %s26_s20  ;;  %s49_s22 = int_to_ptr.vmem [resolvable:$true] %s48_s22 }
  0x4b   :  { %s5852_s3 = scalar_lea.hbm %s6317_s0, 32 }
  0x4c   :  { %p5853_p4 = scmp.ne.s32.totalorder %s6317_s0, %s5852_s3  ;;  %p5856_p5 = scmp.lt.u32.totalorder %s5852_s3, %s6317_s0 }
  0x4e   :  { %p5858_p6 = pnand %p5856_p5, %p5853_p4 }
  0x50   :  { %5861 = shalt.err (!%p5858_p6)
}
  0x51   :  { %s5862_s7 = scalar_lea.vmem %s27_s20, 32  ;;  %p5867_p8 = scmp.lt.s32.totalorder %s27_s20, %s27_s20 }
  0x52   :  { %p5863_p7 = scmp.ne.s32.totalorder %s27_s20, %s5862_s7  ;;  %p5868_p9 = scmp.lt.s32.totalorder %s5862_s7, %s5862_s7 }
  0x54   :  { %p5869_p10 = por %p5868_p9, %p5867_p8 }
  0x56   :  { %p5870_p11 = pnand %p5869_p10, %p5863_p7 }
  0x58   :  { %5873 = shalt.err (!%p5870_p11)
}
  0x59   :  { %29 = dma.hbm_to_vmem [thread:$0]  %s6317_s0, 32, %s27_s20, [#allocation3]  }
  0x5a   :  { %s5874_s1 = scalar_lea.hbm %s6319_s2, 112 }
  0x5b   :  { %p5875_p12 = scmp.ne.s32.totalorder %s6319_s2, %s5874_s1  ;;  %p5878_p13 = scmp.lt.u32.totalorder %s5874_s1, %s6319_s2 }
  0x5d   :  { %p5880_p0 = pnand %p5878_p13, %p5875_p12 }
  0x5f   :  { %5883 = shalt.err (!%p5880_p0)
}
  0x60   :  { %s5884_s5 = scalar_lea.vmem %s49_s22, 112  ;;  %s5888_s16 = scalar_lea.vmem %s49_s22, 128 }
  0x61   :  { %p5885_p1 = scmp.ne.s32.totalorder %s49_s22, %s5884_s5  ;;  %p5889_p2 = scmp.lt.s32.totalorder %s49_s22, %s49_s22 }
  0x62   :  { %p5890_p3 = scmp.lt.s32.totalorder %s5888_s16, %s5884_s5 }
  0x64   :  { %p5891_p4 = por %p5890_p3, %p5889_p2 }
  0x66   :  { %p5892_p5 = pnand %p5891_p4, %p5885_p1 }
  0x68   :  { %5895 = shalt.err (!%p5892_p5)
}
  0x69   :  { %51 = dma.hbm_to_vmem [thread:$0]  %s6319_s2, 112, %s49_s22, [#allocation6]  }
  0x6a   :  { %s6010_s18 = smov [#allocation10]   ;;  %s6011_s20 = smov [#allocation13]  }
  0x6b   :  { %s70_s19 = sshll.u32 %s6010_s18, 4  ;;  %s92_s21 = sshll.u32 %s6011_s20, 4  ;;  %s71_s19 = int_to_ptr.vmem [resolvable:$true] %s70_s19  ;;  %s93_s21 = int_to_ptr.vmem [resolvable:$true] %s92_s21 }
  0x6c   :  { %s5896_s3 = scalar_lea.hbm %s6321_s4, 80 }
  0x6d   :  { %p5897_p6 = scmp.ne.s32.totalorder %s6321_s4, %s5896_s3  ;;  %p5900_p7 = scmp.lt.u32.totalorder %s5896_s3, %s6321_s4 }
  0x6f   :  { %p5902_p8 = pnand %p5900_p7, %p5897_p6 }
  0x71   :  { %5905 = shalt.err (!%p5902_p8)
}
  0x72   :  { %s5906_s2 = scalar_lea.vmem %s71_s19, 80  ;;  %s5910_s22 = scalar_lea.vmem %s71_s19, 96 }
  0x73   :  { %p5907_p9 = scmp.ne.s32.totalorder %s71_s19, %s5906_s2  ;;  %p5911_p10 = scmp.lt.s32.totalorder %s71_s19, %s71_s19 }
  0x74   :  { %p5912_p11 = scmp.lt.s32.totalorder %s5910_s22, %s5906_s2 }
  0x76   :  { %p5913_p12 = por %p5912_p11, %p5911_p10 }
  0x78   :  { %p5914_p13 = pnand %p5913_p12, %p5907_p9 }
  0x7a   :  { %5917 = shalt.err (!%p5914_p13)
}
  0x7b   :  { %73 = dma.hbm_to_vmem [thread:$0]  %s6321_s4, 80, %s71_s19, [#allocation9]  }
  0x7c   :  { %s5918_s12 = scalar_lea.hbm %s6323_s6, 64 }
  0x7d   :  { %p5919_p0 = scmp.ne.s32.totalorder %s6323_s6, %s5918_s12  ;;  %p5922_p1 = scmp.lt.u32.totalorder %s5918_s12, %s6323_s6 }
  0x7f   :  { %p5924_p2 = pnand %p5922_p1, %p5919_p0 }
  0x81   :  { %5927 = shalt.err (!%p5924_p2)
}
  0x82   :  { %s5928_s15 = scalar_lea.vmem %s93_s21, 64  ;;  %p5933_p4 = scmp.lt.s32.totalorder %s93_s21, %s93_s21 }
  0x83   :  { %p5929_p3 = scmp.ne.s32.totalorder %s93_s21, %s5928_s15  ;;  %p5934_p5 = scmp.lt.s32.totalorder %s5928_s15, %s5928_s15 }
  0x85   :  { %p5935_p6 = por %p5934_p5, %p5933_p4 }
  0x87   :  { %p5936_p7 = pnand %p5935_p6, %p5929_p3 }
  0x89   :  { %5939 = shalt.err (!%p5936_p7)
}
  0x8a   :  { %95 = dma.hbm_to_vmem [thread:$0]  %s6323_s6, 64, %s93_s21, [#allocation12]  }
  0x8b   :  { %s6012_s16 = smov [#allocation16]   ;;  %s5940_s19 = scalar_lea.hbm %s6325_s8, 16 }
  0x8c   :  { %s114_s0 = sshll.u32 %s6012_s16, 4  ;;  %p5941_p8 = scmp.ne.s32.totalorder %s6325_s8, %s5940_s19  ;;  %s115_s0 = int_to_ptr.vmem [resolvable:$true] %s114_s0 }
  0x8d   :  { %p5944_p9 = scmp.lt.u32.totalorder %s5940_s19, %s6325_s8 }
  0x8f   :  { %p5946_p10 = pnand %p5944_p9, %p5941_p8 }
  0x91   :  { %5949 = shalt.err (!%p5946_p10)
}
  0x92   :  { %s5950_s24 = scalar_lea.vmem %s115_s0, 16  ;;  %s5954_s6 = scalar_lea.vmem %s115_s0, 32 }
  0x93   :  { %p5951_p11 = scmp.ne.s32.totalorder %s115_s0, %s5950_s24  ;;  %p5955_p12 = scmp.lt.s32.totalorder %s115_s0, %s115_s0 }
  0x94   :  { %p5956_p13 = scmp.lt.s32.totalorder %s5954_s6, %s5950_s24 }
  0x96   :  { %p5957_p0 = por %p5956_p13, %p5955_p12 }
  0x98   :  { %p5958_p1 = pnand %p5957_p0, %p5951_p11 }
  0x9a   :  { %5961 = shalt.err (!%p5958_p1)
}
  0x9b   :  { %117 = dma.hbm_to_vmem [thread:$0]  %s6325_s8, 16, %s115_s0, [#allocation15]  }
  0x9c   :  { %5984 = dma.done.wait [#allocation3], 32  }
  0x9d   :  { %5985 = vsyncadd [#allocation3], 4294967264 }
  0x9e   :  { %5986 = dma.done.wait [#allocation6], 1904  }
  0x9f   :  { %5987 = vsyncadd [#allocation6], 4294965392 }
  0xa0   :  { %5988 = dma.done.wait [#allocation9], 35920  }
  0xa1   :  { %5989 = vsyncadd [#allocation9], 4294931376 }
  0xa2   :  { %5990 = dma.done.wait [#allocation12], 20544  }
  0xa3   :  { %5991 = vsyncadd [#allocation12], 4294946752 }
  0xa4   :  { %5992 = dma.done.wait [#allocation15], 4112  }
  0xa5   :  { %5993 = vsyncadd [#allocation15], 4294963184  ;;  %v6013_v0 = vmov 0   ;;  %v5080_v1 = vld [vmem:[#allocation5 + $0x4] ss:$28 sps:$4 sm:$0xff]   ;;  %vm273_vm0 = vcmask 261120  }
  0xa6   :  { %309 = vmatprep.mubr.bf16.mxu0 %v6013_v0  ;;  %350 = vmatprep.mubr.bf16.mxu1 %v6013_v0  ;;  %v5082_v2 = vld [vmem:[#allocation5] ss:$28 sps:$4 sm:$0xff]   ;;  %v5085_v4 = vld [vmem:[#allocation5 + $0x38] ss:$28 sps:$4 sm:$0xff]   ;;  %v5086_v6 = vld [vmem:[#allocation5 + $0xc] ss:$28 sps:$4 sm:$0xff]  }
  0xa7   :  { %277 = vmatprep.subr.bf16.mxu0 %v5080_v1  ;;  %v5083_v3 = vld [vmem:[#allocation5 + $0x3c] ss:$28 sps:$4 sm:$0xff]   ;;  %v5088_v7 = vld [vmem:[#allocation5 + $0x8] ss:$28 sps:$4 sm:$0xff]   ;;  %318 = vmatprep.subr.bf16.mxu1 %v5086_v6  ;;  %v5094_v11 = vld [vmem:[#allocation5 + $0x14] ss:$28 sps:$4 sm:$0xff]  }
  0xa8   :  { %v146_v5 = vld [vmem:[#allocation2] sm:$0x3]  ;;  %278 = vmatpush1.bf16.msra.mxu0 %v5082_v2  ;;  %v5089_v8 = vld [vmem:[#allocation5 + $0x44] ss:$28 sps:$4 sm:$0xff]   ;;  %319 = vmatpush1.bf16.msra.mxu1 %v5088_v7  ;;  %v5092_v12 = vld [vmem:[#allocation5 + $0x10] ss:$28 sps:$4 sm:$0xff]  }
  0xa9   :  { %279 = vmatprep.subr.bf16.mxu0 %v5083_v3  ;;  %v147_v9 = vpack.c.bf16 %v146_v5, %v146_v5  ;;  %v5091_v10 = vld [vmem:[#allocation5 + $0x40] ss:$28 sps:$4 sm:$0xff]   ;;  %320 = vmatprep.subr.bf16.mxu1 %v5089_v8  ;;  %v5097_v13 = vld [vmem:[#allocation5 + $0x4c] ss:$28 sps:$4 sm:$0xff]   ;;  %v5098_v14 = vld [vmem:[#allocation5 + $0x18] ss:$28 sps:$4 sm:$0xff]  }
  0xaa   :  { %v5095_v15 = vld [vmem:[#allocation5 + $0x48] ss:$28 sps:$4 sm:$0xff]   ;;  %v6014_v16 = vmov 0.0   ;;  %v5102_v17 = vld [vmem:[#allocation8 + $0x4] ss:$20 sps:$4 sm:$0xff]   ;;  %vm6015_vm1 = vmmov 0  }
  0xab   :  { %v5099_v18 = vld [vmem:[#allocation5 + $0x50] ss:$28 sps:$4 sm:$0xff]   ;;  %v5105_v20 = vld [vmem:[#allocation8 + $0xc] ss:$20 sps:$4 sm:$0xff]   ;;  %v5103_v22 = vld [vmem:[#allocation8 + $0x8] ss:$20 sps:$4 sm:$0xff]  }
  0xac   :  { %280 = vmatpush1.bf16.msra.mxu0 %v5085_v4  ;;  %321 = vmatpush1.bf16.msra.mxu1 %v5091_v10  ;;  %v5100_v19 = vld [vmem:[#allocation8] ss:$20 sps:$4 sm:$0xff]   ;;  %v5106_v23 = vld [vmem:[#allocation8 + $0x28] ss:$20 sps:$4 sm:$0xff]   ;;  %v5109_v26 = vld [vmem:[#allocation8 + $0x30] ss:$20 sps:$4 sm:$0xff]  }
  0xad   :  { %359 = vmatprep.subr.bf16.mxu0 %v5094_v11  ;;  %4983 = vmatprep.subr.bf16.mxu1 %v6014_v16  ;;  %v5108_v21 = vld [vmem:[#allocation8 + $0x2c] ss:$20 sps:$4 sm:$0xff]   ;;  %v5111_v24 = vld [vmem:[#allocation8 + $0x34] ss:$20 sps:$4 sm:$0xff]   ;;  %v5112_v27 = vld [vmem:[#allocation8 + $0x50] ss:$20 sps:$4 sm:$0xff]  }
  0xae   :  { %v5114_v25 = vld [vmem:[#allocation8 + $0x54] ss:$20 sps:$4 sm:$0xff]   ;;  %v5117_v28 = vld [vmem:[#allocation8 + $0x5c] ss:$20 sps:$4 sm:$0xff]   ;;  %v5115_v30 = vld [vmem:[#allocation8 + $0x58] ss:$20 sps:$4 sm:$0xff]  }
  0xaf   :  { %4384 = vmatmul.mubr.msk.bf16.vlgmr.msra.gmra.mrb[0].mxu0 %vm273_vm0, %v147_v9  ;;  %4385 = vmatmul.mubr.msk.bf16.vlgmr.msra.gmra.mrb[0].mxu1 %vm273_vm0, %v147_v9  ;;  %v5120_v29 = vld [vmem:[#allocation8 + $0x7c] ss:$20 sps:$4 sm:$0xff]   ;;  %v5118_v31 = vld [vmem:[#allocation8 + $0x78] ss:$20 sps:$4 sm:$0xff]   ;;  %v5121_v34 = vld [vmem:[#allocation8 + $0x80] ss:$20 sps:$4 sm:$0xff]  }
  0xb0   :  { %360 = vmatpush1.bf16.msra.mxu0 %v5092_v12  ;;  %391 = vmatprep.mubr.bf16.mxu0 %v6013_v0  ;;  %v5123_v32 = vld [vmem:[#allocation8 + $0x84] ss:$20 sps:$4 sm:$0xff]   ;;  %v5124_v35 = vld [vmem:[#allocation8 + $0xa0] ss:$20 sps:$4 sm:$0xff]   ;;  %v5127_v38 = vld [vmem:[#allocation8 + $0xa8] ss:$20 sps:$4 sm:$0xff]  }
  0xb1   :  { %361 = vmatprep.subr.bf16.mxu0 %v5097_v13  ;;  %4984 = vmatpush3.bf16.msra.mxu1 %v5098_v14  ;;  %v5126_v33 = vld [vmem:[#allocation8 + $0xa4] ss:$20 sps:$4 sm:$0xff]   ;;  %v5129_v36 = vld [vmem:[#allocation8 + $0xac] ss:$20 sps:$4 sm:$0xff]   ;;  %v5130_v39 = vld [vmem:[#allocation8 + $0xc8] ss:$20 sps:$4 sm:$0xff]  }
  0xb2   :  { %4987 = vmatprep.mubr.msk.bf16.mxu1 %vm6015_vm1, %v6014_v16  ;;  %4985 = vmatprep.subr.bf16.mxu1 %v6014_v16  ;;  %v5132_v37 = vld [vmem:[#allocation8 + $0xcc] ss:$20 sps:$4 sm:$0xff]   ;;  %v5135_v40 = vld [vmem:[#allocation8 + $0xd4] ss:$20 sps:$4 sm:$0xff]   ;;  %v5133_v42 = vld [vmem:[#allocation8 + $0xd0] ss:$20 sps:$4 sm:$0xff]  }
  0xb3   :  { %v5138_v41 = vld [vmem:[#allocation8 + $0xf4] ss:$20 sps:$4 sm:$0xff]   ;;  %v5136_v43 = vld [vmem:[#allocation8 + $0xf0] ss:$20 sps:$4 sm:$0xff]   ;;  %v5139_v46 = vld [vmem:[#allocation8 + $0xf8] ss:$20 sps:$4 sm:$0xff]  }
  0xb4   :  { %362 = vmatpush1.bf16.msra.mxu0 %v5095_v15  ;;  %v5141_v44 = vld [vmem:[#allocation8 + $0xfc] ss:$20 sps:$4 sm:$0xff]   ;;  %v5142_v47 = vld [vmem:[#allocation8 + $0x118] ss:$20 sps:$4 sm:$0xff]   ;;  %v5145_v50 = vld [vmem:[#allocation8 + $0x120] ss:$20 sps:$4 sm:$0xff]  }
  0xb5   :  { %2273 = vmatprep.subr.bf16.mxu0 %v5102_v17  ;;  %4986 = vmatpush3.bf16.msra.mxu1 %v5099_v18  ;;  %v5144_v45 = vld [vmem:[#allocation8 + $0x11c] ss:$20 sps:$4 sm:$0xff]   ;;  %v5147_v48 = vld [vmem:[#allocation8 + $0x124] ss:$20 sps:$4 sm:$0xff]   ;;  %v5148_v51 = vld [vmem:[#allocation8 + $0x140] ss:$20 sps:$4 sm:$0xff]  }
  0xb6   :  { %2437 = vmatprep.subr.bf16.mxu1 %v5105_v20  ;;  %v5150_v49 = vld [vmem:[#allocation8 + $0x144] ss:$20 sps:$4 sm:$0xff]   ;;  %v5153_v52 = vld [vmem:[#allocation8 + $0x14c] ss:$20 sps:$4 sm:$0xff]   ;;  %v5151_v54 = vld [vmem:[#allocation8 + $0x148] ss:$20 sps:$4 sm:$0xff]  }
  0xb7   :  { %4386 = vmatmul.mubr.msk.bf16.vlgmr.msra.gmra.mrb[4].mxu0 %vm273_vm0, %v147_v9  ;;  %v5156_v53 = vld [vmem:[#allocation8 + $0x16c] ss:$20 sps:$4 sm:$0xff]   ;;  %v5154_v55 = vld [vmem:[#allocation8 + $0x168] ss:$20 sps:$4 sm:$0xff]   ;;  %v5157_v58 = vld [vmem:[#allocation8 + $0x170] ss:$20 sps:$4 sm:$0xff]  }
  0xb8   :  { %2274 = vmatpush1.bf16.msra.mxu0 %v5100_v19  ;;  %4988 = vmatmul.mubr.msk.bf16.vlgmr.msra.gmra.mrb[4].mxu1 %vm273_vm0, %v147_v9  ;;  %v5159_v56 = vld [vmem:[#allocation8 + $0x174] ss:$20 sps:$4 sm:$0xff]   ;;  %v5160_v59 = vld [vmem:[#allocation8 + $0x190] ss:$20 sps:$4 sm:$0xff]   ;;  %v5163_v62 = vld [vmem:[#allocation8 + $0x198] ss:$20 sps:$4 sm:$0xff]  }
  0xb9   :  { %2275 = vmatprep.subr.bf16.mxu0 %v5108_v21  ;;  %2438 = vmatpush1.bf16.msra.mxu1 %v5103_v22  ;;  %v5162_v57 = vld [vmem:[#allocation8 + $0x194] ss:$20 sps:$4 sm:$0xff]   ;;  %v5165_v60 = vld [vmem:[#allocation8 + $0x19c] ss:$20 sps:$4 sm:$0xff]   ;;  %v5166_v63 = vld [vmem:[#allocation8 + $0x1b8] ss:$20 sps:$4 sm:$0xff]   ;;  %v166_v22 = vlaneseq }
  0xba   :  { %2439 = vmatprep.subr.bf16.mxu1 %v5111_v24  ;;  %v5168_v61 = vld [vmem:[#allocation8 + $0x1bc] ss:$20 sps:$4 sm:$0xff]   ;;  %v5171_v1 = vld [vmem:[#allocation8 + $0x1c4] ss:$20 sps:$4 sm:$0xff]   ;;  %v5169_v3 = vld [vmem:[#allocation8 + $0x1c0] ss:$20 sps:$4 sm:$0xff]  }
  0xbb   :  { %v5174_v2 = vld [vmem:[#allocation8 + $0x1e4] ss:$20 sps:$4 sm:$0xff]   ;;  %v5172_v4 = vld [vmem:[#allocation8 + $0x1e0] ss:$20 sps:$4 sm:$0xff]   ;;  %v5175_v7 = vld [vmem:[#allocation8 + $0x1e8] ss:$20 sps:$4 sm:$0xff]  }
  0xbc   :  { %2276 = vmatpush1.bf16.msra.mxu0 %v5106_v23  ;;  %v5177_v5 = vld [vmem:[#allocation8 + $0x1ec] ss:$20 sps:$4 sm:$0xff]   ;;  %v5178_v8 = vld [vmem:[#allocation8 + $0x208] ss:$20 sps:$4 sm:$0xff]   ;;  %v5181_v10 = vld [vmem:[#allocation8 + $0x210] ss:$20 sps:$4 sm:$0xff]  }
  0xbd   :  { %2277 = vmatprep.subr.bf16.mxu0 %v5114_v25  ;;  %2440 = vmatpush1.bf16.msra.mxu1 %v5109_v26  ;;  %v5180_v6 = vld [vmem:[#allocation8 + $0x20c] ss:$20 sps:$4 sm:$0xff]   ;;  %v5183_v9 = vld [vmem:[#allocation8 + $0x214] ss:$20 sps:$4 sm:$0xff]   ;;  %v5189_v12 = vld [vmem:[#allocation8 + $0x23c] ss:$20 sps:$4 sm:$0xff]  }
  0xbe   :  { %2441 = vmatprep.subr.bf16.mxu1 %v5117_v28  ;;  %v5186_v11 = vld [vmem:[#allocation8 + $0x234] ss:$20 sps:$4 sm:$0xff]   ;;  %v5184_v13 = vld [vmem:[#allocation8 + $0x230] ss:$20 sps:$4 sm:$0xff]   ;;  %v5187_v14 = vld [vmem:[#allocation8 + $0x238] ss:$20 sps:$4 sm:$0xff]  }
  0xbf   :  { %v5192_v15 = vld [vmem:[#allocation8 + $0x25c] ss:$20 sps:$4 sm:$0xff]   ;;  %v5195_v17 = vld [vmem:[#allocation8 + $0x264] ss:$20 sps:$4 sm:$0xff]   ;;  %v5193_v19 = vld [vmem:[#allocation8 + $0x260] ss:$20 sps:$4 sm:$0xff]  }
  0xc0   :  { %2278 = vmatpush1.bf16.msra.mxu0 %v5112_v27  ;;  %v5190_v18 = vld [vmem:[#allocation8 + $0x258] ss:$20 sps:$4 sm:$0xff]   ;;  %v6186_v23 = vshrl.u32 %v166_v22, 7  ;;  %s6016_s8 = smov [#allocation17]  }
  0xc1   :  { %2279 = vmatprep.subr.bf16.mxu0 %v5120_v29  ;;  %2442 = vmatpush1.bf16.msra.mxu1 %v5115_v30  ;;  %v5198_v20 = vld [vmem:[#allocation8 + $0x284] ss:$20 sps:$4 sm:$0xff]   ;;  %v5201_v21 = vld [vmem:[#allocation8 + $0x28c] ss:$20 sps:$4 sm:$0xff]   ;;  %s4357_s27 = sshll.u32 %s6016_s8, 4  ;;  %s4358_s27 = int_to_ptr.vmem [resolvable:$true] %s4357_s27 }
  0xc2   :  { %2443 = vmatprep.subr.bf16.mxu1 %v5123_v32  ;;  %v6189_v24 = vsub.s32 0, %v6186_v23  ;;  %v6191_v25 = vld [vmem:[#allocation7] sm:$0xff]  ;;  %v6194_v26 = vsub.s32 1, %v6186_v23  ;;  %v6199_v28 = vsub.s32 3, %v6186_v23  ;;  %s5962_s28 = scalar_lea.vmem %s4358_s27, 32  ;;  %p5967_p3 = scmp.lt.s32.totalorder %s4358_s27, %s4358_s27 }
  0xc3   :  { %v5238_v22 = vld [vmem:[#allocation8 + $0x398] ss:$20 sps:$4 sm:$0xff]   ;;  %p5963_p2 = scmp.ne.s32.totalorder %s4358_s27, %s5962_s28  ;;  %p5968_p4 = scmp.lt.s32.totalorder %s5962_s28, %s5962_s28 }
  0xc4   :  { %2280 = vmatpush1.bf16.msra.mxu0 %v5118_v31  ;;  %v169_v27 = vrot.slane %v6191_v25, %v6189_v24  ;;  %v173_v29 = vrot.slane %v6191_v25, %v6194_v26 }
  0xc5   :  { %2281 = vmatprep.subr.bf16.mxu0 %v5126_v33  ;;  %2444 = vmatpush1.bf16.msra.mxu1 %v5121_v34  ;;  %v181_v33 = vrot.slane %v6191_v25, %v6199_v28  ;;  %p5969_p5 = por %p5968_p4, %p5967_p3 }
  0xc6   :  { %2445 = vmatprep.subr.bf16.mxu1 %v5129_v36 }
  0xc7   :  { %p5970_p6 = pnand %p5969_p5, %p5963_p2 }
  0xc8   :  { %2282 = vmatpush1.bf16.msra.mxu0 %v5124_v35 }
  0xc9   :  { %2283 = vmatprep.subr.bf16.mxu0 %v5132_v37  ;;  %2446 = vmatpush1.bf16.msra.mxu1 %v5127_v38 }
  0xca   :  { %2447 = vmatprep.subr.bf16.mxu1 %v5135_v40  ;;  %v5196_v40 = vld [vmem:[#allocation8 + $0x280] ss:$20 sps:$4 sm:$0xff]  }
  0xcc   :  { %2284 = vmatpush1.bf16.msra.mxu0 %v5130_v39 }
  0xcd   :  { %2285 = vmatprep.subr.bf16.mxu0 %v5138_v41  ;;  %2448 = vmatpush1.bf16.msra.mxu1 %v5133_v42  ;;  %v5199_v41 = vld [vmem:[#allocation8 + $0x288] ss:$20 sps:$4 sm:$0xff]  }
  0xce   :  { %2449 = vmatprep.subr.bf16.mxu1 %v5141_v44 }
  0xd0   :  { %2286 = vmatpush1.bf16.msra.mxu0 %v5136_v43 }
  0xd1   :  { %2287 = vmatprep.subr.bf16.mxu0 %v5144_v45  ;;  %2450 = vmatpush1.bf16.msra.mxu1 %v5139_v46 }
  0xd2   :  { %2451 = vmatprep.subr.bf16.mxu1 %v5147_v48  ;;  %v5204_v48 = vld [vmem:[#allocation8 + $0x2ac] ss:$20 sps:$4 sm:$0xff]  }
  0xd4   :  { %2288 = vmatpush1.bf16.msra.mxu0 %v5142_v47 }
  0xd5   :  { %2289 = vmatprep.subr.bf16.mxu0 %v5150_v49  ;;  %2452 = vmatpush1.bf16.msra.mxu1 %v5145_v50  ;;  %v5207_v49 = vld [vmem:[#allocation8 + $0x2b4] ss:$20 sps:$4 sm:$0xff]  }
  0xd6   :  { %2453 = vmatprep.subr.bf16.mxu1 %v5153_v52 }
  0xd8   :  { %2290 = vmatpush1.bf16.msra.mxu0 %v5148_v51 }
  0xd9   :  { %2291 = vmatprep.subr.bf16.mxu0 %v5156_v53  ;;  %2454 = vmatpush1.bf16.msra.mxu1 %v5151_v54  ;;  %v5202_v54 = vld [vmem:[#allocation8 + $0x2a8] ss:$20 sps:$4 sm:$0xff]  }
  0xda   :  { %2455 = vmatprep.subr.bf16.mxu1 %v5159_v56 }
  0xdc   :  { %2292 = vmatpush1.bf16.msra.mxu0 %v5154_v55  ;;  %v5205_v55 = vld [vmem:[#allocation8 + $0x2b0] ss:$20 sps:$4 sm:$0xff]  }
  0xdd   :  { %2293 = vmatprep.subr.bf16.mxu0 %v5162_v57  ;;  %2456 = vmatpush1.bf16.msra.mxu1 %v5157_v58  ;;  %v5210_v57 = vld [vmem:[#allocation8 + $0x2d4] ss:$20 sps:$4 sm:$0xff]   ;;  %v5213_v58 = vld [vmem:[#allocation8 + $0x2dc] ss:$20 sps:$4 sm:$0xff]  }
  0xde   :  { %2457 = vmatprep.subr.bf16.mxu1 %v5165_v60  ;;  %v5208_v60 = vld [vmem:[#allocation8 + $0x2d0] ss:$20 sps:$4 sm:$0xff]  }
  0xe0   :  { %2294 = vmatpush1.bf16.msra.mxu0 %v5160_v59 }
  0xe1   :  { %2295 = vmatprep.subr.bf16.mxu0 %v5168_v61  ;;  %2458 = vmatpush1.bf16.msra.mxu1 %v5163_v62  ;;  %v5211_v61 = vld [vmem:[#allocation8 + $0x2d8] ss:$20 sps:$4 sm:$0xff]   ;;  %v5216_v62 = vld [vmem:[#allocation8 + $0x2fc] ss:$20 sps:$4 sm:$0xff]  }
  0xe2   :  { %2459 = vmatprep.subr.bf16.mxu1 %v5171_v1  ;;  %v5214_v1 = vld [vmem:[#allocation8 + $0x2f8] ss:$20 sps:$4 sm:$0xff]  }
  0xe4   :  { %2296 = vmatpush1.bf16.msra.mxu0 %v5166_v63  ;;  %v5219_v63 = vld [vmem:[#allocation8 + $0x304] ss:$20 sps:$4 sm:$0xff]  }
  0xe5   :  { %2297 = vmatprep.subr.bf16.mxu0 %v5174_v2  ;;  %2460 = vmatpush1.bf16.msra.mxu1 %v5169_v3  ;;  %v5217_v2 = vld [vmem:[#allocation8 + $0x300] ss:$20 sps:$4 sm:$0xff]   ;;  %v5222_v3 = vld [vmem:[#allocation8 + $0x324] ss:$20 sps:$4 sm:$0xff]  }
  0xe6   :  { %2461 = vmatprep.subr.bf16.mxu1 %v5177_v5  ;;  %v5220_v5 = vld [vmem:[#allocation8 + $0x320] ss:$20 sps:$4 sm:$0xff]  }
  0xe8   :  { %2298 = vmatpush1.bf16.msra.mxu0 %v5172_v4  ;;  %v5225_v4 = vld [vmem:[#allocation8 + $0x32c] ss:$20 sps:$4 sm:$0xff]  }
  0xe9   :  { %2299 = vmatprep.subr.bf16.mxu0 %v5180_v6  ;;  %2462 = vmatpush1.bf16.msra.mxu1 %v5175_v7  ;;  %v5223_v6 = vld [vmem:[#allocation8 + $0x328] ss:$20 sps:$4 sm:$0xff]   ;;  %v5228_v7 = vld [vmem:[#allocation8 + $0x34c] ss:$20 sps:$4 sm:$0xff]  }
  0xea   :  { %2463 = vmatprep.subr.bf16.mxu1 %v5183_v9  ;;  %v5226_v9 = vld [vmem:[#allocation8 + $0x348] ss:$20 sps:$4 sm:$0xff]  }
  0xec   :  { %2300 = vmatpush1.bf16.msra.mxu0 %v5178_v8  ;;  %v5231_v8 = vld [vmem:[#allocation8 + $0x354] ss:$20 sps:$4 sm:$0xff]  }
  0xed   :  { %2464 = vmatpush1.bf16.msra.mxu1 %v5181_v10  ;;  %2301 = vmatprep.subr.bf16.mxu0 %v5186_v11  ;;  %v5229_v10 = vld [vmem:[#allocation8 + $0x350] ss:$20 sps:$4 sm:$0xff]   ;;  %v5234_v11 = vld [vmem:[#allocation8 + $0x374] ss:$20 sps:$4 sm:$0xff]  }
  0xee   :  { %2465 = vmatprep.subr.bf16.mxu1 %v5189_v12  ;;  %v5237_v12 = vld [vmem:[#allocation8 + $0x37c] ss:$20 sps:$4 sm:$0xff]  }
  0xf0   :  { %2302 = vmatpush1.bf16.msra.mxu0 %v5184_v13  ;;  %v5232_v13 = vld [vmem:[#allocation8 + $0x370] ss:$20 sps:$4 sm:$0xff]  }
  0xf1   :  { %2466 = vmatpush1.bf16.msra.mxu1 %v5187_v14  ;;  %2303 = vmatprep.subr.bf16.mxu0 %v5192_v15  ;;  %v5235_v14 = vld [vmem:[#allocation8 + $0x378] ss:$20 sps:$4 sm:$0xff]  }
  0xf2   :  { %2467 = vmatprep.subr.bf16.mxu1 %v5195_v17  ;;  %v5240_v17 = vld [vmem:[#allocation8 + $0x39c] ss:$20 sps:$4 sm:$0xff]  }
  0xf4   :  { %2304 = vmatpush1.bf16.msra.mxu0 %v5190_v18  ;;  %v5243_v18 = vld [vmem:[#allocation8 + $0x3a4] ss:$20 sps:$4 sm:$0xff]  }
  0xf5   :  { %2468 = vmatpush1.bf16.msra.mxu1 %v5193_v19  ;;  %2314 = vmatprep.subr.bf16.mxu0 %v5198_v20 }
  0xf6   :  { %2478 = vmatprep.subr.bf16.mxu1 %v5201_v21 }
 0x182   :  { %v311_v30 = vpop.f32.mrb[0].mxu0  ;;  %v6205_v38 = vpop.f32.mrb[0].mxu1 }
 0x183   :  { %v312_v31 = vadd.f32 %v311_v30, %v169_v27  ;;  %v313_v32 = vpop.f32.mrb[1].mxu0  ;;  %v354_v42 = vpop.f32.mrb[1].mxu1  ;;  %v5241_v27 = vld [vmem:[#allocation8 + $0x3a0] ss:$20 sps:$4 sm:$0xff]  }
 0x184   :  { %v314_v34 = vadd.f32 %v313_v32, %v173_v29  ;;  %v315_v35 = vpop.f32.mrb[2].mxu0  ;;  %v355_v43 = vadd.f32 %v354_v42, %v181_v33  ;;  %v356_v44 = vpop.f32.mrb[2].mxu1  ;;  %v5246_v29 = vld [vmem:[#allocation8 + $0x3c4] ss:$20 sps:$4 sm:$0xff]   ;;  %v5249_v30 = vld [vmem:[#allocation8 + $0x3cc] ss:$20 sps:$4 sm:$0xff]  }
 0x185   :  { %v440_v36 = vmax.f32 %v312_v31, 0.0  ;;  %v316_v37 = vpop.f32.mrb[3].mxu0  ;;  %v357_v46 = vpop.f32.mrb[3].mxu1  ;;  %v5244_v31 = vld [vmem:[#allocation8 + $0x3c0] ss:$20 sps:$4 sm:$0xff]  }
 0x186   :  { %v441_v39 = vmax.f32 %v314_v34, 0.0  ;;  %v443_v50 = vmax.f32 %v355_v43, 0.0  ;;  %v5247_v32 = vld [vmem:[#allocation8 + $0x3c8] ss:$20 sps:$4 sm:$0xff]   ;;  %v5252_v33 = vld [vmem:[#allocation8 + $0x3ec] ss:$20 sps:$4 sm:$0xff]  }
 0x187   :  { %v6209_v47 = vpack.c.bf16 %v440_v36, %v440_v36  ;;  %v5255_v34 = vld [vmem:[#allocation8 + $0x3f4] ss:$20 sps:$4 sm:$0xff]   ;;  %v5253_v36 = vld [vmem:[#allocation8 + $0x3f0] ss:$20 sps:$4 sm:$0xff]   ;;  %v5262_v44 = vld [vmem:[#allocation8 + $0x438] ss:$20 sps:$4 sm:$0xff]  }
 0x188   :  { %v6207_v45 = vpack.c.bf16 %v441_v39, %v441_v39  ;;  %v6217_v52 = vpack.c.bf16 %v443_v50, %v443_v50  ;;  %v5250_v35 = vld [vmem:[#allocation8 + $0x3e8] ss:$20 sps:$4 sm:$0xff]   ;;  %v5267_v43 = vld [vmem:[#allocation8 + $0x444] ss:$20 sps:$4 sm:$0xff]   ;;  %v5265_v46 = vld [vmem:[#allocation8 + $0x440] ss:$20 sps:$4 sm:$0xff]  }
 0x189   :  { %v5258_v37 = vld [vmem:[#allocation8 + $0x414] ss:$20 sps:$4 sm:$0xff]   ;;  %v5261_v39 = vld [vmem:[#allocation8 + $0x41c] ss:$20 sps:$4 sm:$0xff]  }
 0x18a   :  { %2305 = vmatprep.mubr.bf16.mxu0 %v6207_v45  ;;  %2469 = vmatprep.mubr.bf16.mxu1 %v6207_v45  ;;  %v6213_v51 = vpop.f32.mrb[4].mxu0  ;;  %v5264_v42 = vld [vmem:[#allocation8 + $0x43c] ss:$20 sps:$4 sm:$0xff]   ;;  %v5268_v50 = vld [vmem:[#allocation8 + $0x460] ss:$20 sps:$4 sm:$0xff]  }
 0x18b   :  { %2306 = vmatmul.mubr.bf16.vlgmr.msra.gmra.mrb[8].mxu0 %v6209_v47  ;;  %2470 = vmatmul.mubr.bf16.vlgmr.msra.gmra.mrb[8].mxu1 %v6209_v47  ;;  %v6219_v53 = vpop.f32.mrb[5].mxu0  ;;  %v6223_v15 = vpop.f32.mrb[4].mxu1 }
 0x18c   :  { %2315 = vmatpush1.bf16.msra.mxu0 %v5196_v40  ;;  %2479 = vmatpush1.bf16.msra.mxu1 %v5199_v41  ;;  %v397_v56 = vpop.f32.mrb[6].mxu0  ;;  %v4989_v19 = vpop.f32.mrb[5].mxu1  ;;  %v5256_v40 = vld [vmem:[#allocation8 + $0x410] ss:$20 sps:$4 sm:$0xff]   ;;  %v5259_v41 = vld [vmem:[#allocation8 + $0x418] ss:$20 sps:$4 sm:$0xff]  }
 0x18d   :  { %2316 = vmatprep.subr.bf16.mxu0 %v5204_v48  ;;  %2480 = vmatprep.subr.bf16.mxu1 %v5207_v49  ;;  %v398_v59 = vpop.f32.mrb[7].mxu0  ;;  %v437_v20 = vpop.f32.mrb[6].mxu1  ;;  %v5270_v48 = vld [vmem:[#allocation8 + $0x464] ss:$20 sps:$4 sm:$0xff]   ;;  %v5273_v49 = vld [vmem:[#allocation8 + $0x46c] ss:$20 sps:$4 sm:$0xff]  }
 0x18e   :  { %2346 = vmatprep.mubr.bf16.mxu0 %v6217_v52  ;;  %2510 = vmatprep.mubr.bf16.mxu1 %v6217_v52  ;;  %v4990_v21 = vpop.f32.mrb[7].mxu1  ;;  %v5276_v56 = vld [vmem:[#allocation8 + $0x48c] ss:$20 sps:$4 sm:$0xff]   ;;  %v188_v59 = vsub.s32 5, %v6186_v23  ;;  %v5298_v20 = vld [vmem:[#allocation8 + $0x528] ss:$20 sps:$4 sm:$0xff]  }
 0x18f   :  { %v5301_v21 = vld [vmem:[#allocation8 + $0x530] ss:$20 sps:$4 sm:$0xff]  }
 0x190   :  { %2317 = vmatpush1.bf16.msra.mxu0 %v5202_v54  ;;  %2481 = vmatpush1.bf16.msra.mxu1 %v5205_v55  ;;  %v5271_v54 = vld [vmem:[#allocation8 + $0x468] ss:$20 sps:$4 sm:$0xff]   ;;  %v6226_v55 = vsub.s32 2, %v6186_v23 }
 0x191   :  { %2318 = vmatprep.subr.bf16.mxu0 %v5210_v57  ;;  %2482 = vmatprep.subr.bf16.mxu1 %v5213_v58  ;;  %v5279_v57 = vld [vmem:[#allocation8 + $0x494] ss:$20 sps:$4 sm:$0xff]  }
 0x192   :  { %v5274_v58 = vld [vmem:[#allocation8 + $0x488] ss:$20 sps:$4 sm:$0xff]  }
 0x194   :  { %2319 = vmatpush1.bf16.msra.mxu0 %v5208_v60  ;;  %2483 = vmatpush1.bf16.msra.mxu1 %v5211_v61  ;;  %v5277_v60 = vld [vmem:[#allocation8 + $0x490] ss:$20 sps:$4 sm:$0xff]   ;;  %v177_v61 = vrot.slane %v6191_v25, %v6226_v55 }
 0x195   :  { %2320 = vmatprep.subr.bf16.mxu0 %v5216_v62  ;;  %2484 = vmatprep.subr.bf16.mxu1 %v5219_v63  ;;  %v5282_v62 = vld [vmem:[#allocation8 + $0x4b4] ss:$20 sps:$4 sm:$0xff]   ;;  %v5285_v63 = vld [vmem:[#allocation8 + $0x4bc] ss:$20 sps:$4 sm:$0xff]  }
 0x198   :  { %2321 = vmatpush1.bf16.msra.mxu0 %v5214_v1  ;;  %2485 = vmatpush1.bf16.msra.mxu1 %v5217_v2  ;;  %v189_v1 = vrot.slane %v6191_v25, %v188_v59  ;;  %v353_v2 = vadd.f32 %v6205_v38, %v177_v61  ;;  %v5345_v59 = vld [vmem:[#allocation8 + $0x64c] ss:$20 sps:$4 sm:$0xff]   ;;  %v5343_v61 = vld [vmem:[#allocation8 + $0x648] ss:$20 sps:$4 sm:$0xff]  }
 0x199   :  { %2322 = vmatprep.subr.bf16.mxu0 %v5222_v3  ;;  %2486 = vmatprep.subr.bf16.mxu1 %v5225_v4  ;;  %v5280_v3 = vld [vmem:[#allocation8 + $0x4b0] ss:$20 sps:$4 sm:$0xff]   ;;  %v5283_v4 = vld [vmem:[#allocation8 + $0x4b8] ss:$20 sps:$4 sm:$0xff]  }
 0x19c   :  { %2323 = vmatpush1.bf16.msra.mxu0 %v5220_v5  ;;  %2487 = vmatpush1.bf16.msra.mxu1 %v5223_v6  ;;  %v5288_v5 = vld [vmem:[#allocation8 + $0x4dc] ss:$20 sps:$4 sm:$0xff]   ;;  %v5291_v6 = vld [vmem:[#allocation8 + $0x4e4] ss:$20 sps:$4 sm:$0xff]  }
 0x19d   :  { %2324 = vmatprep.subr.bf16.mxu0 %v5228_v7  ;;  %2488 = vmatprep.subr.bf16.mxu1 %v5231_v8  ;;  %v396_v7 = vadd.f32 %v6219_v53, %v189_v1  ;;  %v442_v8 = vmax.f32 %v353_v2, 0.0  ;;  %v5303_v53 = vld [vmem:[#allocation8 + $0x534] ss:$20 sps:$4 sm:$0xff]   ;;  %v5349_v2 = vld [vmem:[#allocation8 + $0x670] ss:$20 sps:$4 sm:$0xff]  }
 0x19e   :  { %v5346_v1 = vld [vmem:[#allocation8 + $0x668] ss:$20 sps:$4 sm:$0xff]  }
 0x19f   :  { %v445_v38 = vmax.f32 %v396_v7, 0.0  ;;  %v5360_v7 = vld [vmem:[#allocation8 + $0x6bc] ss:$20 sps:$4 sm:$0xff]  }
 0x1a0   :  { %2325 = vmatpush1.bf16.msra.mxu0 %v5226_v9  ;;  %2489 = vmatpush1.bf16.msra.mxu1 %v5229_v10  ;;  %v5286_v9 = vld [vmem:[#allocation8 + $0x4d8] ss:$20 sps:$4 sm:$0xff]   ;;  %v5289_v10 = vld [vmem:[#allocation8 + $0x4e0] ss:$20 sps:$4 sm:$0xff]  }
 0x1a1   :  { %2326 = vmatprep.subr.bf16.mxu0 %v5234_v11  ;;  %2490 = vmatprep.subr.bf16.mxu1 %v5237_v12  ;;  %v5294_v11 = vld [vmem:[#allocation8 + $0x504] ss:$20 sps:$4 sm:$0xff]   ;;  %v5297_v12 = vld [vmem:[#allocation8 + $0x50c] ss:$20 sps:$4 sm:$0xff]   ;;  %v6236_v19 = vpack.c.bf16 %v445_v38, %v445_v38  ;;  %v184_v38 = vsub.s32 4, %v6186_v23 }
 0x1a4   :  { %2327 = vmatpush1.bf16.msra.mxu0 %v5232_v13  ;;  %2491 = vmatpush1.bf16.msra.mxu1 %v5235_v14  ;;  %v6234_v13 = vpack.c.bf16 %v442_v8, %v442_v8  ;;  %v5292_v14 = vld [vmem:[#allocation8 + $0x500] ss:$20 sps:$4 sm:$0xff]   ;;  %v5363_v8 = vld [vmem:[#allocation8 + $0x6c4] ss:$20 sps:$4 sm:$0xff]  }
 0x1a5   :  { %2328 = vmatprep.subr.bf16.mxu0 %v5240_v17  ;;  %2492 = vmatprep.subr.bf16.mxu1 %v5243_v18  ;;  %v5295_v17 = vld [vmem:[#allocation8 + $0x508] ss:$20 sps:$4 sm:$0xff]   ;;  %v5300_v18 = vld [vmem:[#allocation8 + $0x52c] ss:$20 sps:$4 sm:$0xff]  }
 0x1a8   :  { %2329 = vmatpush1.bf16.msra.mxu0 %v5238_v22  ;;  %2493 = vmatpush1.bf16.msra.mxu1 %v5241_v27  ;;  %v5306_v22 = vld [vmem:[#allocation8 + $0x554] ss:$20 sps:$4 sm:$0xff]   ;;  %v5309_v27 = vld [vmem:[#allocation8 + $0x55c] ss:$20 sps:$4 sm:$0xff]  }
 0x1a9   :  { %2330 = vmatprep.subr.bf16.mxu0 %v5246_v29  ;;  %2494 = vmatprep.subr.bf16.mxu1 %v5249_v30  ;;  %v5304_v29 = vld [vmem:[#allocation8 + $0x550] ss:$20 sps:$4 sm:$0xff]   ;;  %v5307_v30 = vld [vmem:[#allocation8 + $0x558] ss:$20 sps:$4 sm:$0xff]  }
 0x1ac   :  { %2331 = vmatpush1.bf16.msra.mxu0 %v5244_v31  ;;  %2495 = vmatpush1.bf16.msra.mxu1 %v5247_v32  ;;  %v5312_v31 = vld [vmem:[#allocation8 + $0x57c] ss:$20 sps:$4 sm:$0xff]   ;;  %v5315_v32 = vld [vmem:[#allocation8 + $0x584] ss:$20 sps:$4 sm:$0xff]  }
 0x1ad   :  { %2332 = vmatprep.subr.bf16.mxu0 %v5252_v33  ;;  %2496 = vmatprep.subr.bf16.mxu1 %v5255_v34  ;;  %v5310_v33 = vld [vmem:[#allocation8 + $0x578] ss:$20 sps:$4 sm:$0xff]   ;;  %v5313_v34 = vld [vmem:[#allocation8 + $0x580] ss:$20 sps:$4 sm:$0xff]  }
 0x1b0   :  { %2333 = vmatpush1.bf16.msra.mxu0 %v5250_v35  ;;  %2497 = vmatpush1.bf16.msra.mxu1 %v5253_v36  ;;  %v5318_v35 = vld [vmem:[#allocation8 + $0x5a4] ss:$20 sps:$4 sm:$0xff]   ;;  %v5321_v36 = vld [vmem:[#allocation8 + $0x5ac] ss:$20 sps:$4 sm:$0xff]  }
 0x1b1   :  { %2334 = vmatprep.subr.bf16.mxu0 %v5258_v37  ;;  %2498 = vmatprep.subr.bf16.mxu1 %v5261_v39  ;;  %v5316_v37 = vld [vmem:[#allocation8 + $0x5a0] ss:$20 sps:$4 sm:$0xff]   ;;  %v5319_v39 = vld [vmem:[#allocation8 + $0x5a8] ss:$20 sps:$4 sm:$0xff]  }
 0x1b4   :  { %2335 = vmatpush1.bf16.msra.mxu0 %v5256_v40  ;;  %2499 = vmatpush1.bf16.msra.mxu1 %v5259_v41  ;;  %v5324_v40 = vld [vmem:[#allocation8 + $0x5cc] ss:$20 sps:$4 sm:$0xff]   ;;  %v5327_v41 = vld [vmem:[#allocation8 + $0x5d4] ss:$20 sps:$4 sm:$0xff]  }
 0x1b5   :  { %2336 = vmatprep.subr.bf16.mxu0 %v5264_v42  ;;  %2500 = vmatprep.subr.bf16.mxu1 %v5267_v43  ;;  %v5322_v42 = vld [vmem:[#allocation8 + $0x5c8] ss:$20 sps:$4 sm:$0xff]   ;;  %v5325_v43 = vld [vmem:[#allocation8 + $0x5d0] ss:$20 sps:$4 sm:$0xff]  }
 0x1b8   :  { %2337 = vmatpush1.bf16.msra.mxu0 %v5262_v44  ;;  %2501 = vmatpush1.bf16.msra.mxu1 %v5265_v46  ;;  %v5330_v44 = vld [vmem:[#allocation8 + $0x5f4] ss:$20 sps:$4 sm:$0xff]   ;;  %v5333_v46 = vld [vmem:[#allocation8 + $0x5fc] ss:$20 sps:$4 sm:$0xff]  }
 0x1b9   :  { %2338 = vmatprep.subr.bf16.mxu0 %v5270_v48  ;;  %2502 = vmatprep.subr.bf16.mxu1 %v5273_v49  ;;  %v5328_v48 = vld [vmem:[#allocation8 + $0x5f0] ss:$20 sps:$4 sm:$0xff]   ;;  %v5331_v49 = vld [vmem:[#allocation8 + $0x5f8] ss:$20 sps:$4 sm:$0xff]  }
 0x1bc   :  { %2339 = vmatpush1.bf16.msra.mxu0 %v5268_v50  ;;  %2503 = vmatpush1.bf16.msra.mxu1 %v5271_v54  ;;  %v5336_v50 = vld [vmem:[#allocation8 + $0x61c] ss:$20 sps:$4 sm:$0xff]   ;;  %v5339_v54 = vld [vmem:[#allocation8 + $0x624] ss:$20 sps:$4 sm:$0xff]  }
 0x1bd   :  { %2340 = vmatprep.subr.bf16.mxu0 %v5276_v56  ;;  %2504 = vmatprep.subr.bf16.mxu1 %v5279_v57  ;;  %v5334_v56 = vld [vmem:[#allocation8 + $0x618] ss:$20 sps:$4 sm:$0xff]   ;;  %v5337_v57 = vld [vmem:[#allocation8 + $0x620] ss:$20 sps:$4 sm:$0xff]  }
 0x1c0   :  { %2341 = vmatpush1.bf16.msra.mxu0 %v5274_v58  ;;  %2505 = vmatpush1.bf16.msra.mxu1 %v5277_v60  ;;  %v5342_v58 = vld [vmem:[#allocation8 + $0x644] ss:$20 sps:$4 sm:$0xff]   ;;  %v5340_v60 = vld [vmem:[#allocation8 + $0x640] ss:$20 sps:$4 sm:$0xff]  }
 0x1c1   :  { %2342 = vmatprep.subr.bf16.mxu0 %v5282_v62  ;;  %2506 = vmatprep.subr.bf16.mxu1 %v5285_v63  ;;  %v5348_v62 = vld [vmem:[#allocation8 + $0x66c] ss:$20 sps:$4 sm:$0xff]   ;;  %v5351_v63 = vld [vmem:[#allocation8 + $0x674] ss:$20 sps:$4 sm:$0xff]  }
 0x1c4   :  { %2343 = vmatpush1.bf16.msra.mxu0 %v5280_v3  ;;  %2507 = vmatpush1.bf16.msra.mxu1 %v5283_v4  ;;  %v5354_v3 = vld [vmem:[#allocation8 + $0x694] ss:$20 sps:$4 sm:$0xff]   ;;  %v5357_v4 = vld [vmem:[#allocation8 + $0x69c] ss:$20 sps:$4 sm:$0xff]  }
 0x1c5   :  { %2344 = vmatprep.subr.bf16.mxu0 %v5288_v5  ;;  %2508 = vmatprep.subr.bf16.mxu1 %v5291_v6  ;;  %v5352_v5 = vld [vmem:[#allocation8 + $0x690] ss:$20 sps:$4 sm:$0xff]   ;;  %v5355_v6 = vld [vmem:[#allocation8 + $0x698] ss:$20 sps:$4 sm:$0xff]  }
 0x1c8   :  { %2345 = vmatpush1.bf16.msra.mxu0 %v5286_v9  ;;  %2509 = vmatpush1.bf16.msra.mxu1 %v5289_v10  ;;  %v5358_v9 = vld [vmem:[#allocation8 + $0x6b8] ss:$20 sps:$4 sm:$0xff]   ;;  %v5361_v10 = vld [vmem:[#allocation8 + $0x6c0] ss:$20 sps:$4 sm:$0xff]  }
 0x1c9   :  { %2355 = vmatprep.subr.bf16.mxu0 %v5294_v11  ;;  %2519 = vmatprep.subr.bf16.mxu1 %v5297_v12  ;;  %v5366_v11 = vld [vmem:[#allocation8 + $0x6e4] ss:$20 sps:$4 sm:$0xff]   ;;  %v5369_v12 = vld [vmem:[#allocation8 + $0x6ec] ss:$20 sps:$4 sm:$0xff]  }
 0x1cb   :  { %2347 = vmatmul.mubr.bf16.vlgmr.msra.gmra.mrb[8].mxu0 %v6234_v13  ;;  %2511 = vmatmul.mubr.bf16.vlgmr.msra.gmra.mrb[8].mxu1 %v6234_v13 }
 0x1cc   :  { %2356 = vmatpush1.bf16.msra.mxu0 %v5292_v14  ;;  %2520 = vmatpush1.bf16.msra.mxu1 %v5295_v17  ;;  %v5364_v14 = vld [vmem:[#allocation8 + $0x6e0] ss:$20 sps:$4 sm:$0xff]   ;;  %v5367_v17 = vld [vmem:[#allocation8 + $0x6e8] ss:$20 sps:$4 sm:$0xff]  }
 0x1cd   :  { %2357 = vmatprep.subr.bf16.mxu0 %v5300_v18  ;;  %2521 = vmatprep.subr.bf16.mxu1 %v5303_v53  ;;  %v5372_v18 = vld [vmem:[#allocation8 + $0x70c] ss:$20 sps:$4 sm:$0xff]   ;;  %v5375_v53 = vld [vmem:[#allocation8 + $0x714] ss:$20 sps:$4 sm:$0xff]  }
 0x1ce   :  { %2387 = vmatprep.mubr.bf16.mxu0 %v6236_v19  ;;  %2551 = vmatprep.mubr.bf16.mxu1 %v6236_v19 }
 0x1d0   :  { %2358 = vmatpush1.bf16.msra.mxu0 %v5298_v20  ;;  %2522 = vmatpush1.bf16.msra.mxu1 %v5301_v21  ;;  %v185_v20 = vrot.slane %v6191_v25, %v184_v38  ;;  %v5370_v21 = vld [vmem:[#allocation8 + $0x708] ss:$20 sps:$4 sm:$0xff]  }
 0x1d1   :  { %2359 = vmatprep.subr.bf16.mxu0 %v5306_v22  ;;  %2523 = vmatprep.subr.bf16.mxu1 %v5309_v27  ;;  %v5373_v22 = vld [vmem:[#allocation8 + $0x710] ss:$20 sps:$4 sm:$0xff]   ;;  %v5378_v27 = vld [vmem:[#allocation8 + $0x734] ss:$20 sps:$4 sm:$0xff]  }
 0x1d4   :  { %2360 = vmatpush1.bf16.msra.mxu0 %v5304_v29  ;;  %2524 = vmatpush1.bf16.msra.mxu1 %v5307_v30  ;;  %v5381_v29 = vld [vmem:[#allocation8 + $0x73c] ss:$20 sps:$4 sm:$0xff]   ;;  %v394_v30 = vadd.f32 %v6213_v51, %v185_v20  ;;  %v5388_v51 = vld [vmem:[#allocation8 + $0x780] ss:$20 sps:$4 sm:$0xff]  }
 0x1d5   :  { %2361 = vmatprep.subr.bf16.mxu0 %v5312_v31  ;;  %2525 = vmatprep.subr.bf16.mxu1 %v5315_v32  ;;  %v5376_v31 = vld [vmem:[#allocation8 + $0x730] ss:$20 sps:$4 sm:$0xff]   ;;  %v5379_v32 = vld [vmem:[#allocation8 + $0x738] ss:$20 sps:$4 sm:$0xff]  }
 0x1d6   :  { %v5436_v20 = vld [vmem:[#allocation8 + $0x150] ss:$20 sps:$4 sm:$0xff]  }
 0x1d8   :  { %2362 = vmatpush1.bf16.msra.mxu0 %v5310_v33  ;;  %2526 = vmatpush1.bf16.msra.mxu1 %v5313_v34  ;;  %v5384_v33 = vld [vmem:[#allocation8 + $0x75c] ss:$20 sps:$4 sm:$0xff]   ;;  %v5387_v34 = vld [vmem:[#allocation8 + $0x764] ss:$20 sps:$4 sm:$0xff]  }
 0x1d9   :  { %2363 = vmatprep.subr.bf16.mxu0 %v5318_v35  ;;  %2527 = vmatprep.subr.bf16.mxu1 %v5321_v36  ;;  %v444_v35 = vmax.f32 %v394_v30, 0.0  ;;  %v5382_v36 = vld [vmem:[#allocation8 + $0x758] ss:$20 sps:$4 sm:$0xff]  }
 0x1da   :  { %v5441_v30 = vld [vmem:[#allocation8 + $0x3f8] ss:$20 sps:$4 sm:$0xff]  }
 0x1dc   :  { %2364 = vmatpush1.bf16.msra.mxu0 %v5316_v37  ;;  %2528 = vmatpush1.bf16.msra.mxu1 %v5319_v39  ;;  %v5385_v37 = vld [vmem:[#allocation8 + $0x760] ss:$20 sps:$4 sm:$0xff]   ;;  %v5390_v39 = vld [vmem:[#allocation8 + $0x784] ss:$20 sps:$4 sm:$0xff]  }
 0x1dd   :  { %2365 = vmatprep.subr.bf16.mxu0 %v5324_v40  ;;  %2529 = vmatprep.subr.bf16.mxu1 %v5327_v41  ;;  %v5393_v40 = vld [vmem:[#allocation8 + $0x78c] ss:$20 sps:$4 sm:$0xff]   ;;  %v6247_v41 = vpack.c.bf16 %v444_v35, %v444_v35 }
 0x1de   :  { %v5446_v35 = vld [vmem:[#allocation8 + $0x60] ss:$20 sps:$4 sm:$0xff]  }
 0x1e0   :  { %2366 = vmatpush1.bf16.msra.mxu0 %v5322_v42  ;;  %2530 = vmatpush1.bf16.msra.mxu1 %v5325_v43  ;;  %v5391_v42 = vld [vmem:[#allocation8 + $0x788] ss:$20 sps:$4 sm:$0xff]   ;;  %v5396_v43 = vld [vmem:[#allocation8 + $0x7ac] ss:$20 sps:$4 sm:$0xff]  }
 0x1e1   :  { %2367 = vmatprep.subr.bf16.mxu0 %v5330_v44  ;;  %2531 = vmatprep.subr.bf16.mxu1 %v5333_v46  ;;  %v5399_v44 = vld [vmem:[#allocation8 + $0x7b4] ss:$20 sps:$4 sm:$0xff]  }
 0x1e2   :  { %v5394_v46 = vld [vmem:[#allocation8 + $0x7a8] ss:$20 sps:$4 sm:$0xff]  }
 0x1e4   :  { %2368 = vmatpush1.bf16.msra.mxu0 %v5328_v48  ;;  %2532 = vmatpush1.bf16.msra.mxu1 %v5331_v49  ;;  %v5397_v48 = vld [vmem:[#allocation8 + $0x7b0] ss:$20 sps:$4 sm:$0xff]   ;;  %v5402_v49 = vld [vmem:[#allocation8 + $0x7d4] ss:$20 sps:$4 sm:$0xff]  }
 0x1e5   :  { %2369 = vmatprep.subr.bf16.mxu0 %v5336_v50  ;;  %2533 = vmatprep.subr.bf16.mxu1 %v5339_v54  ;;  %v5405_v50 = vld [vmem:[#allocation8 + $0x7dc] ss:$20 sps:$4 sm:$0xff]  }
 0x1e6   :  { %v5400_v54 = vld [vmem:[#allocation8 + $0x7d0] ss:$20 sps:$4 sm:$0xff]  }
 0x1e8   :  { %2370 = vmatpush1.bf16.msra.mxu0 %v5334_v56  ;;  %2534 = vmatpush1.bf16.msra.mxu1 %v5337_v57  ;;  %v5403_v56 = vld [vmem:[#allocation8 + $0x7d8] ss:$20 sps:$4 sm:$0xff]   ;;  %v5408_v57 = vld [vmem:[#allocation8 + $0x7fc] ss:$20 sps:$4 sm:$0xff]  }
 0x1e9   :  { %2371 = vmatprep.subr.bf16.mxu0 %v5342_v58  ;;  %2535 = vmatprep.subr.bf16.mxu1 %v5345_v59  ;;  %v5411_v58 = vld [vmem:[#allocation8 + $0x804] ss:$20 sps:$4 sm:$0xff]  }
 0x1ea   :  { %v5406_v59 = vld [vmem:[#allocation8 + $0x7f8] ss:$20 sps:$4 sm:$0xff]  }
 0x1ec   :  { %2372 = vmatpush1.bf16.msra.mxu0 %v5340_v60  ;;  %2536 = vmatpush1.bf16.msra.mxu1 %v5343_v61  ;;  %v5409_v60 = vld [vmem:[#allocation8 + $0x800] ss:$20 sps:$4 sm:$0xff]   ;;  %v5414_v61 = vld [vmem:[#allocation8 + $0x824] ss:$20 sps:$4 sm:$0xff]  }
 0x1ed   :  { %2373 = vmatprep.subr.bf16.mxu0 %v5348_v62  ;;  %2537 = vmatprep.subr.bf16.mxu1 %v5351_v63  ;;  %v5417_v62 = vld [vmem:[#allocation8 + $0x82c] ss:$20 sps:$4 sm:$0xff]   ;;  %v192_v63 = vsub.s32 6, %v6186_v23 }
 0x1f0   :  { %2374 = vmatpush1.bf16.msra.mxu0 %v5346_v1  ;;  %2538 = vmatpush1.bf16.msra.mxu1 %v5349_v2  ;;  %v5412_v1 = vld [vmem:[#allocation8 + $0x820] ss:$20 sps:$4 sm:$0xff]   ;;  %v5415_v2 = vld [vmem:[#allocation8 + $0x828] ss:$20 sps:$4 sm:$0xff]  }
 0x1f1   :  { %2375 = vmatprep.subr.bf16.mxu0 %v5354_v3  ;;  %2539 = vmatprep.subr.bf16.mxu1 %v5357_v4  ;;  %v5420_v3 = vld [vmem:[#allocation8 + $0x84c] ss:$20 sps:$4 sm:$0xff]   ;;  %v5423_v4 = vld [vmem:[#allocation8 + $0x854] ss:$20 sps:$4 sm:$0xff]  }
 0x1f4   :  { %2376 = vmatpush1.bf16.msra.mxu0 %v5352_v5  ;;  %2540 = vmatpush1.bf16.msra.mxu1 %v5355_v6  ;;  %v193_v5 = vrot.slane %v6191_v25, %v192_v63  ;;  %v5418_v6 = vld [vmem:[#allocation8 + $0x848] ss:$20 sps:$4 sm:$0xff]   ;;  %v5430_v25 = vld [vmem:[#allocation8 + $0x898] ss:$20 sps:$4 sm:$0xff]   ;;  %v5469_v63 = vld [vmem:[#allocation8 + $0x510] ss:$20 sps:$4 sm:$0xff]  }
 0x1f5   :  { %2377 = vmatprep.subr.bf16.mxu0 %v5360_v7  ;;  %2541 = vmatprep.subr.bf16.mxu1 %v5363_v8  ;;  %v5421_v7 = vld [vmem:[#allocation8 + $0x850] ss:$20 sps:$4 sm:$0xff]   ;;  %v5426_v8 = vld [vmem:[#allocation8 + $0x874] ss:$20 sps:$4 sm:$0xff]  }
 0x1f8   :  { %2378 = vmatpush1.bf16.msra.mxu0 %v5358_v9  ;;  %2542 = vmatpush1.bf16.msra.mxu1 %v5361_v10  ;;  %v5429_v9 = vld [vmem:[#allocation8 + $0x87c] ss:$20 sps:$4 sm:$0xff]   ;;  %v435_v10 = vadd.f32 %v6223_v15, %v193_v5  ;;  %v5474_v5 = vld [vmem:[#allocation8 + $0x6a0] ss:$20 sps:$4 sm:$0xff]  }
 0x1f9   :  { %2379 = vmatprep.subr.bf16.mxu0 %v5366_v11  ;;  %2543 = vmatprep.subr.bf16.mxu1 %v5369_v12  ;;  %v5424_v11 = vld [vmem:[#allocation8 + $0x870] ss:$20 sps:$4 sm:$0xff]   ;;  %v5427_v12 = vld [vmem:[#allocation8 + $0x878] ss:$20 sps:$4 sm:$0xff]  }
 0x1fa   :  { %v5438_v15 = vld [vmem:[#allocation8 + $0x10] ss:$20 sps:$4 sm:$0xff]  }
 0x1fc   :  { %2380 = vmatpush1.bf16.msra.mxu0 %v5364_v14  ;;  %2544 = vmatpush1.bf16.msra.mxu1 %v5367_v17  ;;  %v5432_v14 = vld [vmem:[#allocation8 + $0x89c] ss:$20 sps:$4 sm:$0xff]   ;;  %v5435_v17 = vld [vmem:[#allocation8 + $0x8a4] ss:$20 sps:$4 sm:$0xff]  }
 0x1fd   :  { %2381 = vmatprep.subr.bf16.mxu0 %v5372_v18  ;;  %2545 = vmatprep.subr.bf16.mxu1 %v5375_v53  ;;  %v446_v18 = vmax.f32 %v435_v10, 0.0  ;;  %v5433_v53 = vld [vmem:[#allocation8 + $0x8a0] ss:$20 sps:$4 sm:$0xff]   ;;  %v5482_v10 = vld [vmem:[#allocation8 + $0x830] ss:$20 sps:$4 sm:$0xff]  }
 0x200   :  { %2382 = vmatpush1.bf16.msra.mxu0 %v5370_v21  ;;  %2546 = vmatpush1.bf16.msra.mxu1 %v5373_v22  ;;  %v5437_v21 = vld [vmem:[#allocation8 + $0x3d0] ss:$20 sps:$4 sm:$0xff]   ;;  %v6256_v22 = vpack.c.bf16 %v446_v18, %v446_v18  ;;  %v5487_v18 = vld [vmem:[#allocation8 + $0x600] ss:$20 sps:$4 sm:$0xff]  }
 0x201   :  { %2383 = vmatprep.subr.bf16.mxu0 %v5378_v27  ;;  %2547 = vmatprep.subr.bf16.mxu1 %v5381_v29  ;;  %v5439_v27 = vld [vmem:[#allocation8 + $0x290] ss:$20 sps:$4 sm:$0xff]   ;;  %v5440_v29 = vld [vmem:[#allocation8 + $0x178] ss:$20 sps:$4 sm:$0xff]  }
 0x204   :  { %2384 = vmatpush1.bf16.msra.mxu0 %v5376_v31  ;;  %2548 = vmatpush1.bf16.msra.mxu1 %v5379_v32  ;;  %v5442_v31 = vld [vmem:[#allocation8 + $0x38] ss:$20 sps:$4 sm:$0xff]  }
 0x205   :  { %2385 = vmatprep.subr.bf16.mxu0 %v5384_v33  ;;  %2549 = vmatprep.subr.bf16.mxu1 %v5387_v34  ;;  %v5443_v32 = vld [vmem:[#allocation8 + $0x2b8] ss:$20 sps:$4 sm:$0xff]   ;;  %v5444_v33 = vld [vmem:[#allocation8 + $0x1a0] ss:$20 sps:$4 sm:$0xff]  }
 0x206   :  { %v5445_v34 = vld [vmem:[#allocation8 + $0x420] ss:$20 sps:$4 sm:$0xff]  }
 0x208   :  { %2386 = vmatpush1.bf16.msra.mxu0 %v5382_v36  ;;  %2550 = vmatpush1.bf16.msra.mxu1 %v5385_v37  ;;  %v5447_v36 = vld [vmem:[#allocation8 + $0x2e0] ss:$20 sps:$4 sm:$0xff]   ;;  %v5448_v37 = vld [vmem:[#allocation8 + $0x1c8] ss:$20 sps:$4 sm:$0xff]  }
 0x209   :  { %2396 = vmatprep.subr.bf16.mxu0 %v5390_v39  ;;  %2560 = vmatprep.subr.bf16.mxu1 %v5393_v40  ;;  %v5449_v39 = vld [vmem:[#allocation8 + $0x448] ss:$20 sps:$4 sm:$0xff]  }
 0x20a   :  { %v5450_v40 = vld [vmem:[#allocation8 + $0x88] ss:$20 sps:$4 sm:$0xff]  }
 0x20b   :  { %2388 = vmatmul.mubr.bf16.vlgmr.msra.gmra.mrb[8].mxu0 %v6247_v41  ;;  %2552 = vmatmul.mubr.bf16.vlgmr.msra.gmra.mrb[8].mxu1 %v6247_v41 }
 0x20c   :  { %2397 = vmatpush1.bf16.msra.mxu0 %v5388_v51  ;;  %2561 = vmatpush1.bf16.msra.mxu1 %v5391_v42  ;;  %v5452_v51 = vld [vmem:[#allocation8 + $0x1f0] ss:$20 sps:$4 sm:$0xff]  }
 0x20d   :  { %2398 = vmatprep.subr.bf16.mxu0 %v5396_v43  ;;  %2562 = vmatprep.subr.bf16.mxu1 %v5399_v44  ;;  %v5454_v42 = vld [vmem:[#allocation8 + $0xb0] ss:$20 sps:$4 sm:$0xff]   ;;  %v5456_v44 = vld [vmem:[#allocation8 + $0x218] ss:$20 sps:$4 sm:$0xff]  }
 0x20e   :  { %2428 = vmatprep.mubr.bf16.mxu0 %v6013_v0  ;;  %2592 = vmatprep.mubr.bf16.mxu1 %v6013_v0  ;;  %v5455_v43 = vld [vmem:[#allocation8 + $0x330] ss:$20 sps:$4 sm:$0xff]  }
 0x210   :  { %2399 = vmatpush1.bf16.msra.mxu0 %v5394_v46  ;;  %2563 = vmatpush1.bf16.msra.mxu1 %v5397_v48  ;;  %v5457_v46 = vld [vmem:[#allocation8 + $0x498] ss:$20 sps:$4 sm:$0xff]  }
 0x211   :  { %2400 = vmatprep.subr.bf16.mxu0 %v5402_v49  ;;  %2564 = vmatprep.subr.bf16.mxu1 %v5405_v50  ;;  %v5458_v48 = vld [vmem:[#allocation8 + $0xd8] ss:$20 sps:$4 sm:$0xff]   ;;  %v5460_v50 = vld [vmem:[#allocation8 + $0x240] ss:$20 sps:$4 sm:$0xff]  }
 0x212   :  { %v5459_v49 = vld [vmem:[#allocation8 + $0x358] ss:$20 sps:$4 sm:$0xff]  }
 0x214   :  { %2401 = vmatpush1.bf16.msra.mxu0 %v5400_v54  ;;  %2565 = vmatpush1.bf16.msra.mxu1 %v5403_v56  ;;  %v5461_v54 = vld [vmem:[#allocation8 + $0x4c0] ss:$20 sps:$4 sm:$0xff]  }
 0x215   :  { %2402 = vmatprep.subr.bf16.mxu0 %v5408_v57  ;;  %2566 = vmatprep.subr.bf16.mxu1 %v5411_v58  ;;  %v5462_v56 = vld [vmem:[#allocation8 + $0x100] ss:$20 sps:$4 sm:$0xff]   ;;  %v5464_v58 = vld [vmem:[#allocation8 + $0x268] ss:$20 sps:$4 sm:$0xff]  }
 0x216   :  { %v5463_v57 = vld [vmem:[#allocation8 + $0x380] ss:$20 sps:$4 sm:$0xff]  }
 0x218   :  { %2403 = vmatpush1.bf16.msra.mxu0 %v5406_v59  ;;  %2567 = vmatpush1.bf16.msra.mxu1 %v5409_v60  ;;  %v5465_v59 = vld [vmem:[#allocation8 + $0x4e8] ss:$20 sps:$4 sm:$0xff]  }
 0x219   :  { %2404 = vmatprep.subr.bf16.mxu0 %v5414_v61  ;;  %2568 = vmatprep.subr.bf16.mxu1 %v5417_v62  ;;  %v5466_v60 = vld [vmem:[#allocation8 + $0x128] ss:$20 sps:$4 sm:$0xff]   ;;  %v5468_v62 = vld [vmem:[#allocation8 + $0x650] ss:$20 sps:$4 sm:$0xff]  }
 0x21a   :  { %v5467_v61 = vld [vmem:[#allocation8 + $0x3a8] ss:$20 sps:$4 sm:$0xff]  }
 0x21c   :  { %2405 = vmatpush1.bf16.msra.mxu0 %v5412_v1  ;;  %2569 = vmatpush1.bf16.msra.mxu1 %v5415_v2  ;;  %v5470_v1 = vld [vmem:[#allocation8 + $0x790] ss:$20 sps:$4 sm:$0xff]   ;;  %v5471_v2 = vld [vmem:[#allocation8 + $0x678] ss:$20 sps:$4 sm:$0xff]  }
 0x21d   :  { %2406 = vmatprep.subr.bf16.mxu0 %v5420_v3  ;;  %2570 = vmatprep.subr.bf16.mxu1 %v5423_v4  ;;  %v5472_v3 = vld [vmem:[#allocation8 + $0x538] ss:$20 sps:$4 sm:$0xff]  }
 0x21e   :  { %v5473_v4 = vld [vmem:[#allocation8 + $0x7b8] ss:$20 sps:$4 sm:$0xff]  }
 0x220   :  { %2407 = vmatpush1.bf16.msra.mxu0 %v5418_v6  ;;  %2571 = vmatpush1.bf16.msra.mxu1 %v5421_v7  ;;  %v5475_v6 = vld [vmem:[#allocation8 + $0x560] ss:$20 sps:$4 sm:$0xff]   ;;  %v5477_v7 = vld [vmem:[#allocation8 + $0x6c8] ss:$20 sps:$4 sm:$0xff]  }
 0x221   :  { %2408 = vmatprep.subr.bf16.mxu0 %v5426_v8  ;;  %2572 = vmatprep.subr.bf16.mxu1 %v5429_v9  ;;  %v5480_v8 = vld [vmem:[#allocation8 + $0x6f0] ss:$20 sps:$4 sm:$0xff]  }
 0x222   :  { %v5481_v9 = vld [vmem:[#allocation8 + $0x5b0] ss:$20 sps:$4 sm:$0xff]  }
 0x224   :  { %2409 = vmatpush1.bf16.msra.mxu0 %v5424_v11  ;;  %2573 = vmatpush1.bf16.msra.mxu1 %v5427_v12  ;;  %v5483_v11 = vld [vmem:[#allocation8 + $0x718] ss:$20 sps:$4 sm:$0xff]  }
 0x225   :  { %2410 = vmatprep.subr.bf16.mxu0 %v5432_v14  ;;  %2574 = vmatprep.subr.bf16.mxu1 %v5435_v17  ;;  %v5484_v12 = vld [vmem:[#allocation8 + $0x5d8] ss:$20 sps:$4 sm:$0xff]   ;;  %v5486_v17 = vld [vmem:[#allocation8 + $0x740] ss:$20 sps:$4 sm:$0xff]  }
 0x226   :  { %v5485_v14 = vld [vmem:[#allocation8 + $0x858] ss:$20 sps:$4 sm:$0xff]  }
 0x228   :  { %2411 = vmatpush1.bf16.msra.mxu0 %v5430_v25  ;;  %2575 = vmatpush1.bf16.msra.mxu1 %v5433_v53  ;;  %v5488_v25 = vld [vmem:[#allocation8 + $0x880] ss:$20 sps:$4 sm:$0xff]   ;;  %v5489_v53 = vld [vmem:[#allocation8 + $0x768] ss:$20 sps:$4 sm:$0xff]  }
 0x229   :  { %4864 = vmatprep.subr.bf16.mxu0 %v5436_v20  ;;  %4886 = vmatprep.subr.bf16.mxu1 %v5437_v21  ;;  %v5490_v20 = vld [vmem:[#allocation8 + $0x628] ss:$20 sps:$4 sm:$0xff]  }
 0x22a   :  { %v5491_v21 = vld [vmem:[#allocation8 + $0x8a8] ss:$20 sps:$4 sm:$0xff]  }
 0x22b   :  { %2429 = vmatmul.mubr.bf16.vlgmr.msra.gmra.mrb[8].mxu0 %v6256_v22  ;;  %2593 = vmatmul.mubr.bf16.vlgmr.msra.gmra.mrb[8].mxu1 %v6256_v22 }
 0x22c   :  { %4865 = vmatpush3.bf16.msra.mxu0 %v5438_v15  ;;  %2633 = vmatprep.mubr.bf16.mxu0 %v6207_v45  ;;  %v5451_v45 = vld [vmem:[#allocation8 + $0x308] ss:$20 sps:$4 sm:$0xff]  }
 0x22d   :  { %4887 = vmatpush3.bf16.msra.mxu1 %v5439_v27  ;;  %2673 = vmatprep.mubr.bf16.mxu1 %v6217_v52  ;;  %v5453_v52 = vld [vmem:[#allocation8 + $0x470] ss:$20 sps:$4 sm:$0xff]   ;;  %v5494_v15 = vld [vmem:[#allocation11 + $0x4] ss:$16 sps:$4 sm:$0xff]  }
 0x22e   :  { %4866 = vmatprep.subr.bf16.mxu0 %v5440_v29  ;;  %4888 = vmatprep.subr.bf16.mxu1 %v5441_v30  ;;  %v5497_v27 = vld [vmem:[#allocation11 + $0xc] ss:$16 sps:$4 sm:$0xff]   ;;  %v5492_v29 = vld [vmem:[#allocation11] ss:$16 sps:$4 sm:$0xff]   ;;  %v5495_v30 = vld [vmem:[#allocation11 + $0x8] ss:$16 sps:$4 sm:$0xff]  }
 0x230   :  { %4867 = vmatpush3.bf16.msra.mxu0 %v5442_v31  ;;  %v5500_v31 = vld [vmem:[#allocation11 + $0x24] ss:$16 sps:$4 sm:$0xff]  }
 0x231   :  { %4889 = vmatpush3.bf16.msra.mxu1 %v5443_v32  ;;  %4868 = vmatprep.subr.bf16.mxu0 %v5444_v33  ;;  %v5503_v32 = vld [vmem:[#allocation11 + $0x2c] ss:$16 sps:$4 sm:$0xff]   ;;  %v5498_v33 = vld [vmem:[#allocation11 + $0x20] ss:$16 sps:$4 sm:$0xff]  }
 0x232   :  { %4890 = vmatprep.subr.bf16.mxu1 %v5445_v34  ;;  %v5501_v34 = vld [vmem:[#allocation11 + $0x28] ss:$16 sps:$4 sm:$0xff]  }
 0x234   :  { %4869 = vmatpush3.bf16.msra.mxu0 %v5446_v35  ;;  %v5506_v35 = vld [vmem:[#allocation11 + $0x44] ss:$16 sps:$4 sm:$0xff]  }
 0x235   :  { %4891 = vmatpush3.bf16.msra.mxu1 %v5447_v36  ;;  %4870 = vmatprep.subr.bf16.mxu0 %v5448_v37  ;;  %v5504_v36 = vld [vmem:[#allocation11 + $0x40] ss:$16 sps:$4 sm:$0xff]   ;;  %v5507_v37 = vld [vmem:[#allocation11 + $0x48] ss:$16 sps:$4 sm:$0xff]  }
 0x236   :  { %4892 = vmatprep.subr.bf16.mxu1 %v5449_v39  ;;  %v5512_v39 = vld [vmem:[#allocation11 + $0x64] ss:$16 sps:$4 sm:$0xff]  }
 0x238   :  { %4871 = vmatpush3.bf16.msra.mxu0 %v5450_v40  ;;  %v5515_v40 = vld [vmem:[#allocation11 + $0x6c] ss:$16 sps:$4 sm:$0xff]  }
 0x239   :  { %4893 = vmatpush3.bf16.msra.mxu1 %v5451_v45  ;;  %4872 = vmatprep.subr.bf16.mxu0 %v5452_v51  ;;  %v5518_v45 = vld [vmem:[#allocation11 + $0x84] ss:$16 sps:$4 sm:$0xff]   ;;  %v5521_v51 = vld [vmem:[#allocation11 + $0x8c] ss:$16 sps:$4 sm:$0xff]  }
 0x23a   :  { %4894 = vmatprep.subr.bf16.mxu1 %v5453_v52  ;;  %v5516_v52 = vld [vmem:[#allocation11 + $0x80] ss:$16 sps:$4 sm:$0xff]  }
 0x23c   :  { %4873 = vmatpush3.bf16.msra.mxu0 %v5454_v42  ;;  %v5519_v42 = vld [vmem:[#allocation11 + $0x88] ss:$16 sps:$4 sm:$0xff]  }
 0x23d   :  { %4895 = vmatpush3.bf16.msra.mxu1 %v5455_v43  ;;  %4874 = vmatprep.subr.bf16.mxu0 %v5456_v44  ;;  %v5524_v43 = vld [vmem:[#allocation11 + $0xa4] ss:$16 sps:$4 sm:$0xff]   ;;  %v5527_v44 = vld [vmem:[#allocation11 + $0xac] ss:$16 sps:$4 sm:$0xff]  }
 0x23e   :  { %4896 = vmatprep.subr.bf16.mxu1 %v5457_v46  ;;  %v5522_v46 = vld [vmem:[#allocation11 + $0xa0] ss:$16 sps:$4 sm:$0xff]  }
 0x240   :  { %4875 = vmatpush3.bf16.msra.mxu0 %v5458_v48  ;;  %v5525_v48 = vld [vmem:[#allocation11 + $0xa8] ss:$16 sps:$4 sm:$0xff]  }
 0x241   :  { %4897 = vmatpush3.bf16.msra.mxu1 %v5459_v49  ;;  %4876 = vmatprep.subr.bf16.mxu0 %v5460_v50  ;;  %v5530_v49 = vld [vmem:[#allocation11 + $0xc4] ss:$16 sps:$4 sm:$0xff]   ;;  %v5533_v50 = vld [vmem:[#allocation11 + $0xcc] ss:$16 sps:$4 sm:$0xff]  }
 0x242   :  { %4898 = vmatprep.subr.bf16.mxu1 %v5461_v54  ;;  %v5528_v54 = vld [vmem:[#allocation11 + $0xc0] ss:$16 sps:$4 sm:$0xff]  }
 0x244   :  { %4877 = vmatpush3.bf16.msra.mxu0 %v5462_v56  ;;  %v5531_v56 = vld [vmem:[#allocation11 + $0xc8] ss:$16 sps:$4 sm:$0xff]  }
 0x245   :  { %4899 = vmatpush3.bf16.msra.mxu1 %v5463_v57  ;;  %4878 = vmatprep.subr.bf16.mxu0 %v5464_v58  ;;  %v5536_v57 = vld [vmem:[#allocation11 + $0xe4] ss:$16 sps:$4 sm:$0xff]   ;;  %v5539_v58 = vld [vmem:[#allocation11 + $0xec] ss:$16 sps:$4 sm:$0xff]  }
 0x246   :  { %4900 = vmatprep.subr.bf16.mxu1 %v5465_v59  ;;  %v5534_v59 = vld [vmem:[#allocation11 + $0xe0] ss:$16 sps:$4 sm:$0xff]  }
 0x248   :  { %4879 = vmatpush3.bf16.msra.mxu0 %v5466_v60  ;;  %v5537_v60 = vld [vmem:[#allocation11 + $0xe8] ss:$16 sps:$4 sm:$0xff]  }
 0x249   :  { %4901 = vmatpush3.bf16.msra.mxu1 %v5467_v61  ;;  %4908 = vmatprep.subr.bf16.mxu0 %v5468_v62  ;;  %v5542_v61 = vld [vmem:[#allocation11 + $0x104] ss:$16 sps:$4 sm:$0xff]   ;;  %v5545_v62 = vld [vmem:[#allocation11 + $0x10c] ss:$16 sps:$4 sm:$0xff]  }
 0x24a   :  { %4991 = vmatprep.subr.bf16.mxu1 %v6014_v16 }
 0x24b   :  { %2634 = vmatmul.mubr.bf16.vlgmr.msra.gmra.mrb[12].mxu0 %v6209_v47  ;;  %v5476_v47 = vld [vmem:[#allocation8 + $0x7e0] ss:$20 sps:$4 sm:$0xff]  }
 0x24c   :  { %2674 = vmatmul.mubr.bf16.vlgmr.msra.gmra.mrb[12].mxu1 %v6234_v13  ;;  %4909 = vmatpush3.bf16.msra.mxu0 %v5469_v63  ;;  %v5478_v13 = vld [vmem:[#allocation8 + $0x588] ss:$20 sps:$4 sm:$0xff]  }
 0x24d   :  { %2713 = vmatprep.mubr.bf16.mxu0 %v6236_v19  ;;  %4992 = vmatpush3.bf16.msra.mxu1 %v5470_v1  ;;  %v5479_v19 = vld [vmem:[#allocation8 + $0x808] ss:$20 sps:$4 sm:$0xff]  }
 0x24e   :  { %4910 = vmatprep.subr.bf16.mxu0 %v5471_v2  ;;  %4993 = vmatprep.subr.bf16.mxu1 %v6014_v16  ;;  %v5540_v63 = vld [vmem:[#allocation11 + $0x100] ss:$16 sps:$4 sm:$0xff]   ;;  %v5543_v1 = vld [vmem:[#allocation11 + $0x108] ss:$16 sps:$4 sm:$0xff]   ;;  %v5548_v2 = vld [vmem:[#allocation11 + $0x124] ss:$16 sps:$4 sm:$0xff]  }
 0x24f   :  { %5007 = vmatprep.mubr.msk.bf16.mxu1 %vm6015_vm1, %v6014_v16 }
 0x250   :  { %4911 = vmatpush3.bf16.msra.mxu0 %v5472_v3  ;;  %v5551_v3 = vld [vmem:[#allocation11 + $0x12c] ss:$16 sps:$4 sm:$0xff]  }
 0x251   :  { %4994 = vmatpush3.bf16.msra.mxu1 %v5473_v4  ;;  %4912 = vmatprep.subr.bf16.mxu0 %v5474_v5  ;;  %v5546_v4 = vld [vmem:[#allocation11 + $0x120] ss:$16 sps:$4 sm:$0xff]   ;;  %v5549_v5 = vld [vmem:[#allocation11 + $0x128] ss:$16 sps:$4 sm:$0xff]  }
 0x252   :  { %4995 = vmatprep.subr.bf16.mxu1 %v6014_v16 }
 0x254   :  { %4913 = vmatpush3.bf16.msra.mxu0 %v5475_v6  ;;  %v5554_v6 = vld [vmem:[#allocation11 + $0x144] ss:$16 sps:$4 sm:$0xff]  }
 0x255   :  { %4996 = vmatpush3.bf16.msra.mxu1 %v5476_v47  ;;  %4914 = vmatprep.subr.bf16.mxu0 %v5477_v7  ;;  %v5557_v47 = vld [vmem:[#allocation11 + $0x14c] ss:$16 sps:$4 sm:$0xff]   ;;  %v5552_v7 = vld [vmem:[#allocation11 + $0x140] ss:$16 sps:$4 sm:$0xff]  }
 0x256   :  { %4997 = vmatprep.subr.bf16.mxu1 %v6014_v16 }
 0x258   :  { %4915 = vmatpush3.bf16.msra.mxu0 %v5478_v13  ;;  %v5555_v13 = vld [vmem:[#allocation11 + $0x148] ss:$16 sps:$4 sm:$0xff]  }
 0x259   :  { %4998 = vmatpush3.bf16.msra.mxu1 %v5479_v19  ;;  %4916 = vmatprep.subr.bf16.mxu0 %v5480_v8  ;;  %v5560_v19 = vld [vmem:[#allocation11 + $0x164] ss:$16 sps:$4 sm:$0xff]   ;;  %v5563_v8 = vld [vmem:[#allocation11 + $0x16c] ss:$16 sps:$4 sm:$0xff]  }
 0x25a   :  { %4999 = vmatprep.subr.bf16.mxu1 %v6014_v16 }
 0x25c   :  { %4917 = vmatpush3.bf16.msra.mxu0 %v5481_v9  ;;  %v5558_v9 = vld [vmem:[#allocation11 + $0x160] ss:$16 sps:$4 sm:$0xff]  }
 0x25d   :  { %5000 = vmatpush3.bf16.msra.mxu1 %v5482_v10  ;;  %4918 = vmatprep.subr.bf16.mxu0 %v5483_v11  ;;  %v5561_v10 = vld [vmem:[#allocation11 + $0x168] ss:$16 sps:$4 sm:$0xff]   ;;  %v5566_v11 = vld [vmem:[#allocation11 + $0x184] ss:$16 sps:$4 sm:$0xff]  }
 0x25e   :  { %5001 = vmatprep.subr.bf16.mxu1 %v6014_v16 }
 0x260   :  { %4919 = vmatpush3.bf16.msra.mxu0 %v5484_v12  ;;  %v5569_v12 = vld [vmem:[#allocation11 + $0x18c] ss:$16 sps:$4 sm:$0xff]  }
 0x261   :  { %5002 = vmatpush3.bf16.msra.mxu1 %v5485_v14  ;;  %4920 = vmatprep.subr.bf16.mxu0 %v5486_v17  ;;  %v5564_v14 = vld [vmem:[#allocation11 + $0x180] ss:$16 sps:$4 sm:$0xff]   ;;  %v5567_v17 = vld [vmem:[#allocation11 + $0x188] ss:$16 sps:$4 sm:$0xff]  }
 0x262   :  { %5003 = vmatprep.subr.bf16.mxu1 %v6014_v16 }
 0x264   :  { %4921 = vmatpush3.bf16.msra.mxu0 %v5487_v18  ;;  %v5572_v18 = vld [vmem:[#allocation11 + $0x1a4] ss:$16 sps:$4 sm:$0xff]  }
 0x265   :  { %5004 = vmatpush3.bf16.msra.mxu1 %v5488_v25  ;;  %4922 = vmatprep.subr.bf16.mxu0 %v5489_v53  ;;  %v5575_v25 = vld [vmem:[#allocation11 + $0x1ac] ss:$16 sps:$4 sm:$0xff]   ;;  %v5570_v53 = vld [vmem:[#allocation11 + $0x1a0] ss:$16 sps:$4 sm:$0xff]  }
 0x266   :  { %5005 = vmatprep.subr.bf16.mxu1 %v6014_v16  ;;  %v5509_v16 = vld [vmem:[#allocation11 + $0x4c] ss:$16 sps:$4 sm:$0xff]  }
 0x268   :  { %4923 = vmatpush3.bf16.msra.mxu0 %v5490_v20  ;;  %v5573_v20 = vld [vmem:[#allocation11 + $0x1a8] ss:$16 sps:$4 sm:$0xff]  }
 0x269   :  { %5006 = vmatpush3.bf16.msra.mxu1 %v5491_v21  ;;  %3753 = vmatprep.subr.bf16.mxu0 %v5494_v15  ;;  %v5578_v21 = vld [vmem:[#allocation11 + $0x1c4] ss:$16 sps:$4 sm:$0xff]   ;;  %v5581_v15 = vld [vmem:[#allocation11 + $0x1cc] ss:$16 sps:$4 sm:$0xff]  }
 0x26a   :  { %3876 = vmatprep.subr.bf16.mxu1 %v5497_v27  ;;  %v5576_v27 = vld [vmem:[#allocation11 + $0x1c0] ss:$16 sps:$4 sm:$0xff]  }
 0x26b   :  { %2714 = vmatmul.mubr.bf16.vlgmr.msra.gmra.mrb[16].mxu0 %v6247_v41  ;;  %v5510_v41 = vld [vmem:[#allocation11 + $0x60] ss:$16 sps:$4 sm:$0xff]  }
 0x26c   :  { %5008 = vmatmul.mubr.bf16.vlgmr.msra.gmra.mrb[16].mxu1 %v6256_v22  ;;  %3754 = vmatpush1.bf16.msra.mxu0 %v5492_v29  ;;  %v5513_v22 = vld [vmem:[#allocation11 + $0x68] ss:$16 sps:$4 sm:$0xff]  }
 0x26d   :  { %3877 = vmatpush1.bf16.msra.mxu1 %v5495_v30  ;;  %3755 = vmatprep.subr.bf16.mxu0 %v5500_v31  ;;  %v5579_v29 = vld [vmem:[#allocation11 + $0x1c8] ss:$16 sps:$4 sm:$0xff]   ;;  %v5584_v30 = vld [vmem:[#allocation11 + $0x1e4] ss:$16 sps:$4 sm:$0xff]   ;;  %v5587_v31 = vld [vmem:[#allocation11 + $0x1ec] ss:$16 sps:$4 sm:$0xff]  }
 0x26e   :  { %3878 = vmatprep.subr.bf16.mxu1 %v5503_v32  ;;  %v5582_v32 = vld [vmem:[#allocation11 + $0x1e0] ss:$16 sps:$4 sm:$0xff]  }
 0x270   :  { %3756 = vmatpush1.bf16.msra.mxu0 %v5498_v33  ;;  %v5585_v33 = vld [vmem:[#allocation11 + $0x1e8] ss:$16 sps:$4 sm:$0xff]  }
 0x271   :  { %3879 = vmatpush1.bf16.msra.mxu1 %v5501_v34  ;;  %3757 = vmatprep.subr.bf16.mxu0 %v5506_v35  ;;  %v5590_v34 = vld [vmem:[#allocation11 + $0x204] ss:$16 sps:$4 sm:$0xff]   ;;  %v5593_v35 = vld [vmem:[#allocation11 + $0x20c] ss:$16 sps:$4 sm:$0xff]  }
 0x272   :  { %3880 = vmatprep.subr.bf16.mxu1 %v5509_v16  ;;  %v6277_v16 = vld [vmem:[#allocation10] sm:$0x1f] }
 0x274   :  { %3758 = vmatpush1.bf16.msra.mxu0 %v5504_v36  ;;  %v795_v36 = vrot.slane %v6277_v16, %v6189_v24 }
 0x275   :  { %3881 = vmatpush1.bf16.msra.mxu1 %v5507_v37  ;;  %3759 = vmatprep.subr.bf16.mxu0 %v5512_v39  ;;  %v799_v37 = vrot.slane %v6277_v16, %v6194_v26  ;;  %v807_v39 = vrot.slane %v6277_v16, %v6199_v28 }
 0x276   :  { %3882 = vmatprep.subr.bf16.mxu1 %v5515_v40 }
 0x278   :  { %3760 = vmatpush1.bf16.msra.mxu0 %v5510_v41 }
 0x279   :  { %3883 = vmatpush1.bf16.msra.mxu1 %v5513_v22  ;;  %3761 = vmatprep.subr.bf16.mxu0 %v5518_v45 }
 0x27a   :  { %3884 = vmatprep.subr.bf16.mxu1 %v5521_v51 }
 0x27c   :  { %3762 = vmatpush1.bf16.msra.mxu0 %v5516_v52 }
 0x27d   :  { %3885 = vmatpush1.bf16.msra.mxu1 %v5519_v42  ;;  %3763 = vmatprep.subr.bf16.mxu0 %v5524_v43 }
 0x27e   :  { %3886 = vmatprep.subr.bf16.mxu1 %v5527_v44 }
 0x280   :  { %3764 = vmatpush1.bf16.msra.mxu0 %v5522_v46 }
 0x281   :  { %3887 = vmatpush1.bf16.msra.mxu1 %v5525_v48  ;;  %3765 = vmatprep.subr.bf16.mxu0 %v5530_v49 }
 0x282   :  { %3888 = vmatprep.subr.bf16.mxu1 %v5533_v50 }
 0x284   :  { %3766 = vmatpush1.bf16.msra.mxu0 %v5528_v54 }
 0x285   :  { %3889 = vmatpush1.bf16.msra.mxu1 %v5531_v56  ;;  %3767 = vmatprep.subr.bf16.mxu0 %v5536_v57  ;;  %v5588_v57 = vld [vmem:[#allocation11 + $0x200] ss:$16 sps:$4 sm:$0xff]  }
 0x286   :  { %3890 = vmatprep.subr.bf16.mxu1 %v5539_v58  ;;  %v5591_v58 = vld [vmem:[#allocation11 + $0x208] ss:$16 sps:$4 sm:$0xff]  }
 0x288   :  { %3768 = vmatpush1.bf16.msra.mxu0 %v5534_v59 }
 0x289   :  { %3891 = vmatpush1.bf16.msra.mxu1 %v5537_v60  ;;  %3769 = vmatprep.subr.bf16.mxu0 %v5542_v61  ;;  %v5596_v60 = vld [vmem:[#allocation11 + $0x224] ss:$16 sps:$4 sm:$0xff]   ;;  %v5599_v61 = vld [vmem:[#allocation11 + $0x22c] ss:$16 sps:$4 sm:$0xff]  }
 0x28a   :  { %3892 = vmatprep.subr.bf16.mxu1 %v5545_v62 }
 0x28c   :  { %3770 = vmatpush1.bf16.msra.mxu0 %v5540_v63  ;;  %v5594_v63 = vld [vmem:[#allocation11 + $0x220] ss:$16 sps:$4 sm:$0xff]  }
 0x28d   :  { %3893 = vmatpush1.bf16.msra.mxu1 %v5543_v1  ;;  %3771 = vmatprep.subr.bf16.mxu0 %v5548_v2  ;;  %v5597_v1 = vld [vmem:[#allocation11 + $0x228] ss:$16 sps:$4 sm:$0xff]   ;;  %v5602_v2 = vld [vmem:[#allocation11 + $0x244] ss:$16 sps:$4 sm:$0xff]  }
 0x28e   :  { %3894 = vmatprep.subr.bf16.mxu1 %v5551_v3  ;;  %v5605_v3 = vld [vmem:[#allocation11 + $0x24c] ss:$16 sps:$4 sm:$0xff]  }
 0x290   :  { %3772 = vmatpush1.bf16.msra.mxu0 %v5546_v4  ;;  %v5600_v4 = vld [vmem:[#allocation11 + $0x240] ss:$16 sps:$4 sm:$0xff]  }
 0x291   :  { %3895 = vmatpush1.bf16.msra.mxu1 %v5549_v5  ;;  %3773 = vmatprep.subr.bf16.mxu0 %v5554_v6  ;;  %v5603_v5 = vld [vmem:[#allocation11 + $0x248] ss:$16 sps:$4 sm:$0xff]   ;;  %v5608_v6 = vld [vmem:[#allocation11 + $0x264] ss:$16 sps:$4 sm:$0xff]  }
 0x292   :  { %3896 = vmatprep.subr.bf16.mxu1 %v5557_v47  ;;  %v5611_v47 = vld [vmem:[#allocation11 + $0x26c] ss:$16 sps:$4 sm:$0xff]  }
 0x294   :  { %3774 = vmatpush1.bf16.msra.mxu0 %v5552_v7  ;;  %v5606_v7 = vld [vmem:[#allocation11 + $0x260] ss:$16 sps:$4 sm:$0xff]  }
 0x295   :  { %3897 = vmatpush1.bf16.msra.mxu1 %v5555_v13  ;;  %3775 = vmatprep.subr.bf16.mxu0 %v5560_v19  ;;  %v5609_v13 = vld [vmem:[#allocation11 + $0x268] ss:$16 sps:$4 sm:$0xff]   ;;  %v5614_v19 = vld [vmem:[#allocation11 + $0x284] ss:$16 sps:$4 sm:$0xff]  }
 0x296   :  { %3898 = vmatprep.subr.bf16.mxu1 %v5563_v8  ;;  %v5617_v8 = vld [vmem:[#allocation11 + $0x28c] ss:$16 sps:$4 sm:$0xff]  }
 0x298   :  { %3776 = vmatpush1.bf16.msra.mxu0 %v5558_v9  ;;  %v5612_v9 = vld [vmem:[#allocation11 + $0x280] ss:$16 sps:$4 sm:$0xff]  }
 0x299   :  { %3899 = vmatpush1.bf16.msra.mxu1 %v5561_v10  ;;  %3777 = vmatprep.subr.bf16.mxu0 %v5566_v11  ;;  %v5615_v10 = vld [vmem:[#allocation11 + $0x288] ss:$16 sps:$4 sm:$0xff]   ;;  %v5620_v11 = vld [vmem:[#allocation11 + $0x2a4] ss:$16 sps:$4 sm:$0xff]  }
 0x29a   :  { %3900 = vmatprep.subr.bf16.mxu1 %v5569_v12  ;;  %v5623_v12 = vld [vmem:[#allocation11 + $0x2ac] ss:$16 sps:$4 sm:$0xff]  }
 0x29c   :  { %3778 = vmatpush1.bf16.msra.mxu0 %v5564_v14  ;;  %v5618_v14 = vld [vmem:[#allocation11 + $0x2a0] ss:$16 sps:$4 sm:$0xff]  }
 0x29d   :  { %3901 = vmatpush1.bf16.msra.mxu1 %v5567_v17  ;;  %3779 = vmatprep.subr.bf16.mxu0 %v5572_v18  ;;  %v5621_v17 = vld [vmem:[#allocation11 + $0x2a8] ss:$16 sps:$4 sm:$0xff]   ;;  %v5626_v18 = vld [vmem:[#allocation11 + $0x2c4] ss:$16 sps:$4 sm:$0xff]  }
 0x29e   :  { %3902 = vmatprep.subr.bf16.mxu1 %v5575_v25  ;;  %v5629_v25 = vld [vmem:[#allocation11 + $0x2cc] ss:$16 sps:$4 sm:$0xff]  }
 0x2a0   :  { %3780 = vmatpush1.bf16.msra.mxu0 %v5570_v53  ;;  %v5624_v53 = vld [vmem:[#allocation11 + $0x2c0] ss:$16 sps:$4 sm:$0xff]  }
 0x2a1   :  { %3903 = vmatpush1.bf16.msra.mxu1 %v5573_v20  ;;  %3781 = vmatprep.subr.bf16.mxu0 %v5578_v21  ;;  %v5627_v20 = vld [vmem:[#allocation11 + $0x2c8] ss:$16 sps:$4 sm:$0xff]   ;;  %v5632_v21 = vld [vmem:[#allocation11 + $0x2e4] ss:$16 sps:$4 sm:$0xff]  }
 0x2a2   :  { %3904 = vmatprep.subr.bf16.mxu1 %v5581_v15  ;;  %v5635_v15 = vld [vmem:[#allocation11 + $0x2ec] ss:$16 sps:$4 sm:$0xff]  }
 0x2a4   :  { %3782 = vmatpush1.bf16.msra.mxu0 %v5576_v27 }
 0x2a5   :  { %3905 = vmatpush1.bf16.msra.mxu1 %v5579_v29  ;;  %3783 = vmatprep.subr.bf16.mxu0 %v5584_v30  ;;  %v811_v29 = vrot.slane %v6277_v16, %v184_v38  ;;  %v5636_v38 = vld [vmem:[#allocation11 + $0x300] ss:$16 sps:$4 sm:$0xff]  }
 0x2a6   :  { %3906 = vmatprep.subr.bf16.mxu1 %v5587_v31 }
 0x2a8   :  { %3784 = vmatpush1.bf16.msra.mxu0 %v5582_v32 }
 0x2a9   :  { %3907 = vmatpush1.bf16.msra.mxu1 %v5585_v33  ;;  %3794 = vmatprep.subr.bf16.mxu0 %v5590_v34 }
 0x2aa   :  { %3917 = vmatprep.subr.bf16.mxu1 %v5593_v35  ;;  %v5630_v35 = vld [vmem:[#allocation11 + $0x2e0] ss:$16 sps:$4 sm:$0xff]  }
 0x2fe   :  { %v2430_v40 = vpop.f32.mrb[8].mxu0  ;;  %v6285_v41 = vpop.f32.mrb[8].mxu1 }
 0x2ff   :  { %v5011_v22 = vadd.f32 %v2430_v40, %v795_v36  ;;  %v2432_v45 = vpop.f32.mrb[9].mxu0  ;;  %v2596_v51 = vpop.f32.mrb[9].mxu1  ;;  %v5633_v36 = vld [vmem:[#allocation11 + $0x2e8] ss:$16 sps:$4 sm:$0xff]  }
 0x300   :  { %v5012_v52 = vadd.f32 %v2432_v45, %v799_v37  ;;  %v5014_v42 = vadd.f32 %v2596_v51, %v807_v39  ;;  %v2434_v43 = vpop.f32.mrb[10].mxu0  ;;  %v2598_v44 = vpop.f32.mrb[10].mxu1  ;;  %v5641_v45 = vld [vmem:[#allocation11 + $0x30c] ss:$16 sps:$4 sm:$0xff]  }
 0x301   :  { %v2761_v46 = vmax.f32 %v5011_v22, 0.0  ;;  %v2435_v48 = vpop.f32.mrb[11].mxu0  ;;  %v2599_v49 = vpop.f32.mrb[11].mxu1  ;;  %v5638_v22 = vld [vmem:[#allocation11 + $0x304] ss:$16 sps:$4 sm:$0xff]  }
 0x302   :  { %v2762_v50 = vmax.f32 %v5012_v52, 0.0  ;;  %v2764_v54 = vmax.f32 %v5014_v42, 0.0  ;;  %v5639_v42 = vld [vmem:[#allocation11 + $0x308] ss:$16 sps:$4 sm:$0xff]   ;;  %v5644_v43 = vld [vmem:[#allocation11 + $0x324] ss:$16 sps:$4 sm:$0xff]  }
 0x303   :  { %v2766_v59 = vpack.c.bf16 %v2761_v46, %v2761_v46  ;;  %v5647_v44 = vld [vmem:[#allocation11 + $0x32c] ss:$16 sps:$4 sm:$0xff]   ;;  %v5642_v46 = vld [vmem:[#allocation11 + $0x320] ss:$16 sps:$4 sm:$0xff]   ;;  %v5645_v48 = vld [vmem:[#allocation11 + $0x328] ss:$16 sps:$4 sm:$0xff]  }
 0x304   :  { %v2767_v56 = vpack.c.bf16 %v2762_v50, %v2762_v50  ;;  %v2769_v62 = vpack.c.bf16 %v2764_v54, %v2764_v54  ;;  %v5650_v49 = vld [vmem:[#allocation11 + $0x344] ss:$16 sps:$4 sm:$0xff]   ;;  %v5653_v50 = vld [vmem:[#allocation11 + $0x34c] ss:$16 sps:$4 sm:$0xff]   ;;  %v5648_v54 = vld [vmem:[#allocation11 + $0x340] ss:$16 sps:$4 sm:$0xff]  }
 0x306   :  { %3785 = vmatprep.mubr.bf16.mxu0 %v2767_v56  ;;  %3908 = vmatprep.mubr.bf16.mxu1 %v2767_v56  ;;  %v5651_v56 = vld [vmem:[#allocation11 + $0x348] ss:$16 sps:$4 sm:$0xff]  }
 0x307   :  { %3786 = vmatmul.mubr.bf16.vlgmr.msra.gmra.mrb[20].mxu0 %v2766_v59  ;;  %3909 = vmatmul.mubr.bf16.vlgmr.msra.gmra.mrb[20].mxu1 %v2766_v59  ;;  %v5654_v59 = vld [vmem:[#allocation11 + $0x360] ss:$16 sps:$4 sm:$0xff]  }
 0x308   :  { %3795 = vmatpush1.bf16.msra.mxu0 %v5588_v57  ;;  %3918 = vmatpush1.bf16.msra.mxu1 %v5591_v58  ;;  %v5656_v57 = vld [vmem:[#allocation11 + $0x364] ss:$16 sps:$4 sm:$0xff]   ;;  %v5659_v58 = vld [vmem:[#allocation11 + $0x36c] ss:$16 sps:$4 sm:$0xff]  }
 0x309   :  { %3826 = vmatprep.mubr.bf16.mxu0 %v2769_v62  ;;  %3949 = vmatprep.mubr.bf16.mxu1 %v2769_v62  ;;  %v5665_v62 = vld [vmem:[#allocation11 + $0x38c] ss:$16 sps:$4 sm:$0xff]  }
 0x30a   :  { %3796 = vmatprep.subr.bf16.mxu0 %v5596_v60  ;;  %3919 = vmatprep.subr.bf16.mxu1 %v5599_v61  ;;  %v5657_v60 = vld [vmem:[#allocation11 + $0x368] ss:$16 sps:$4 sm:$0xff]   ;;  %v5662_v61 = vld [vmem:[#allocation11 + $0x384] ss:$16 sps:$4 sm:$0xff]  }
 0x30c   :  { %3797 = vmatpush1.bf16.msra.mxu0 %v5594_v63  ;;  %3920 = vmatpush1.bf16.msra.mxu1 %v5597_v1  ;;  %v5660_v63 = vld [vmem:[#allocation11 + $0x380] ss:$16 sps:$4 sm:$0xff]   ;;  %v5663_v1 = vld [vmem:[#allocation11 + $0x388] ss:$16 sps:$4 sm:$0xff]  }
 0x30d   :  { %3798 = vmatprep.subr.bf16.mxu0 %v5602_v2  ;;  %3921 = vmatprep.subr.bf16.mxu1 %v5605_v3  ;;  %v5668_v2 = vld [vmem:[#allocation11 + $0x3a4] ss:$16 sps:$4 sm:$0xff]   ;;  %v5671_v3 = vld [vmem:[#allocation11 + $0x3ac] ss:$16 sps:$4 sm:$0xff]  }
 0x310   :  { %3799 = vmatpush1.bf16.msra.mxu0 %v5600_v4  ;;  %3922 = vmatpush1.bf16.msra.mxu1 %v5603_v5  ;;  %v5666_v4 = vld [vmem:[#allocation11 + $0x3a0] ss:$16 sps:$4 sm:$0xff]   ;;  %v5669_v5 = vld [vmem:[#allocation11 + $0x3a8] ss:$16 sps:$4 sm:$0xff]  }
 0x311   :  { %3800 = vmatprep.subr.bf16.mxu0 %v5608_v6  ;;  %3923 = vmatprep.subr.bf16.mxu1 %v5611_v47  ;;  %v803_v6 = vrot.slane %v6277_v16, %v6226_v55  ;;  %v5674_v47 = vld [vmem:[#allocation11 + $0x3c4] ss:$16 sps:$4 sm:$0xff]  }
 0x314   :  { %3801 = vmatpush1.bf16.msra.mxu0 %v5606_v7  ;;  %3924 = vmatpush1.bf16.msra.mxu1 %v5609_v13  ;;  %v5677_v7 = vld [vmem:[#allocation11 + $0x3cc] ss:$16 sps:$4 sm:$0xff]   ;;  %v5672_v13 = vld [vmem:[#allocation11 + $0x3c0] ss:$16 sps:$4 sm:$0xff]  }
 0x315   :  { %3802 = vmatprep.subr.bf16.mxu0 %v5614_v19  ;;  %3925 = vmatprep.subr.bf16.mxu1 %v5617_v8  ;;  %v5675_v19 = vld [vmem:[#allocation11 + $0x3c8] ss:$16 sps:$4 sm:$0xff]   ;;  %v5013_v8 = vadd.f32 %v6285_v41, %v803_v6  ;;  %v5689_v41 = vld [vmem:[#allocation11 + $0x40c] ss:$16 sps:$4 sm:$0xff]  }
 0x318   :  { %3803 = vmatpush1.bf16.msra.mxu0 %v5612_v9  ;;  %3926 = vmatpush1.bf16.msra.mxu1 %v5615_v10  ;;  %v5680_v9 = vld [vmem:[#allocation11 + $0x3e4] ss:$16 sps:$4 sm:$0xff]   ;;  %v5683_v10 = vld [vmem:[#allocation11 + $0x3ec] ss:$16 sps:$4 sm:$0xff]  }
 0x319   :  { %3804 = vmatprep.subr.bf16.mxu0 %v5620_v11  ;;  %3927 = vmatprep.subr.bf16.mxu1 %v5623_v12 }
 0x31c   :  { %3805 = vmatpush1.bf16.msra.mxu0 %v5618_v14  ;;  %3928 = vmatpush1.bf16.msra.mxu1 %v5621_v17  ;;  %v5678_v17 = vld [vmem:[#allocation11 + $0x3e0] ss:$16 sps:$4 sm:$0xff]  }
 0x31d   :  { %3806 = vmatprep.subr.bf16.mxu0 %v5626_v18  ;;  %3929 = vmatprep.subr.bf16.mxu1 %v5629_v25 }
 0x31e   :  { %v4880_v27 = vpop.f32.mrb[12].mxu0 }
 0x31f   :  { %v4902_v30 = vpop.f32.mrb[12].mxu1  ;;  %v4881_v31 = vpop.f32.mrb[13].mxu0 }
 0x320   :  { %v4882_v32 = vadd.f32 %v4881_v31, %v4880_v27  ;;  %v4903_v33 = vpop.f32.mrb[13].mxu1  ;;  %3807 = vmatpush1.bf16.msra.mxu0 %v5624_v53  ;;  %3930 = vmatpush1.bf16.msra.mxu1 %v5627_v20  ;;  %v4883_v34 = vpop.f32.mrb[14].mxu0  ;;  %v5681_v53 = vld [vmem:[#allocation11 + $0x3e8] ss:$16 sps:$4 sm:$0xff]   ;;  %v5686_v20 = vld [vmem:[#allocation11 + $0x404] ss:$16 sps:$4 sm:$0xff]  }
 0x321   :  { %v4904_v37 = vadd.f32 %v4903_v33, %v4902_v30  ;;  %v4905_v39 = vpop.f32.mrb[14].mxu1  ;;  %v4884_v40 = vpop.f32.mrb[15].mxu0  ;;  %3808 = vmatprep.subr.bf16.mxu0 %v5632_v21  ;;  %3931 = vmatprep.subr.bf16.mxu1 %v5635_v15  ;;  %v2763_v21 = vmax.f32 %v5013_v8, 0.0  ;;  %v5687_v33 = vld [vmem:[#allocation11 + $0x408] ss:$16 sps:$4 sm:$0xff]  }
 0x322   :  { %v2636_v51 = vadd.f32 %v4882_v32, %v811_v29  ;;  %v4906_v23 = vpop.f32.mrb[15].mxu1  ;;  %v5684_v32 = vld [vmem:[#allocation11 + $0x400] ss:$16 sps:$4 sm:$0xff]   ;;  %v5693_v39 = vld [vmem:[#allocation11 + $0x428] ss:$16 sps:$4 sm:$0xff]  }
 0x323   :  { %v2768_v34 = vpack.c.bf16 %v2763_v21, %v2763_v21  ;;  %v5698_v40 = vld [vmem:[#allocation11 + $0x444] ss:$16 sps:$4 sm:$0xff]   ;;  %v5752_v21 = vld [vmem:[#allocation14 + $0x68] sm:$0xff]  }
 0x324   :  { %v6290_v52 = vadd.f32 %v4904_v37, %v2636_v51  ;;  %3809 = vmatpush1.bf16.msra.mxu0 %v5630_v35  ;;  %3932 = vmatpush1.bf16.msra.mxu1 %v5633_v36  ;;  %v5692_v35 = vld [vmem:[#allocation11 + $0x424] ss:$16 sps:$4 sm:$0xff]   ;;  %v5695_v36 = vld [vmem:[#allocation11 + $0x42c] ss:$16 sps:$4 sm:$0xff]   ;;  %v5690_v37 = vld [vmem:[#allocation11 + $0x420] ss:$16 sps:$4 sm:$0xff]  }
 0x325   :  { %3810 = vmatprep.subr.bf16.mxu0 %v5638_v22  ;;  %3933 = vmatprep.subr.bf16.mxu1 %v5641_v45  ;;  %v5701_v22 = vld [vmem:[#allocation11 + $0x44c] ss:$16 sps:$4 sm:$0xff]   ;;  %v5696_v45 = vld [vmem:[#allocation11 + $0x440] ss:$16 sps:$4 sm:$0xff]   ;;  %v5699_v51 = vld [vmem:[#allocation11 + $0x448] ss:$16 sps:$4 sm:$0xff]  }
 0x326   :  { %v5704_v23 = vld [vmem:[#allocation11 + $0x464] ss:$16 sps:$4 sm:$0xff]  }
 0x327   :  { %v5740_v8 = vld [vmem:[#allocation14 + $0x50] sm:$0xff]  }
 0x328   :  { %3811 = vmatpush1.bf16.msra.mxu0 %v5636_v38  ;;  %3934 = vmatpush1.bf16.msra.mxu1 %v5639_v42  ;;  %v5702_v38 = vld [vmem:[#allocation11 + $0x460] ss:$16 sps:$4 sm:$0xff]   ;;  %v5705_v42 = vld [vmem:[#allocation11 + $0x468] ss:$16 sps:$4 sm:$0xff]  }
 0x329   :  { %3812 = vmatprep.subr.bf16.mxu0 %v5644_v43  ;;  %3935 = vmatprep.subr.bf16.mxu1 %v5647_v44  ;;  %v5710_v43 = vld [vmem:[#allocation11 + $0x484] ss:$16 sps:$4 sm:$0xff]   ;;  %v5713_v44 = vld [vmem:[#allocation11 + $0x48c] ss:$16 sps:$4 sm:$0xff]  }
 0x32c   :  { %3813 = vmatpush1.bf16.msra.mxu0 %v5642_v46  ;;  %3936 = vmatpush1.bf16.msra.mxu1 %v5645_v48  ;;  %v5708_v46 = vld [vmem:[#allocation11 + $0x480] ss:$16 sps:$4 sm:$0xff]   ;;  %v5716_v48 = vld [vmem:[#allocation11 + $0x4a4] ss:$16 sps:$4 sm:$0xff]  }
 0x32d   :  { %3814 = vmatprep.subr.bf16.mxu0 %v5650_v49  ;;  %3937 = vmatprep.subr.bf16.mxu1 %v5653_v50  ;;  %v5719_v49 = vld [vmem:[#allocation11 + $0x4ac] ss:$16 sps:$4 sm:$0xff]   ;;  %v5714_v50 = vld [vmem:[#allocation11 + $0x4a0] ss:$16 sps:$4 sm:$0xff]  }
 0x330   :  { %3815 = vmatpush1.bf16.msra.mxu0 %v5648_v54  ;;  %3938 = vmatpush1.bf16.msra.mxu1 %v5651_v56  ;;  %v5717_v54 = vld [vmem:[#allocation11 + $0x4a8] ss:$16 sps:$4 sm:$0xff]   ;;  %v5722_v56 = vld [vmem:[#allocation11 + $0x4c4] ss:$16 sps:$4 sm:$0xff]  }
 0x331   :  { %3816 = vmatprep.subr.bf16.mxu0 %v5656_v57  ;;  %3939 = vmatprep.subr.bf16.mxu1 %v5659_v58  ;;  %v5725_v57 = vld [vmem:[#allocation11 + $0x4cc] ss:$16 sps:$4 sm:$0xff]   ;;  %v5720_v58 = vld [vmem:[#allocation11 + $0x4c0] ss:$16 sps:$4 sm:$0xff]  }
 0x334   :  { %3817 = vmatpush1.bf16.msra.mxu0 %v5654_v59  ;;  %3940 = vmatpush1.bf16.msra.mxu1 %v5657_v60  ;;  %v5723_v59 = vld [vmem:[#allocation11 + $0x4c8] ss:$16 sps:$4 sm:$0xff]   ;;  %v5728_v60 = vld [vmem:[#allocation11 + $0x4e4] ss:$16 sps:$4 sm:$0xff]  }
 0x335   :  { %3818 = vmatprep.subr.bf16.mxu0 %v5662_v61  ;;  %3941 = vmatprep.subr.bf16.mxu1 %v5665_v62  ;;  %v5731_v61 = vld [vmem:[#allocation11 + $0x4ec] ss:$16 sps:$4 sm:$0xff]   ;;  %v5726_v62 = vld [vmem:[#allocation11 + $0x4e0] ss:$16 sps:$4 sm:$0xff]  }
 0x338   :  { %3819 = vmatpush1.bf16.msra.mxu0 %v5660_v63  ;;  %3942 = vmatpush1.bf16.msra.mxu1 %v5663_v1  ;;  %v5729_v63 = vld [vmem:[#allocation11 + $0x4e8] ss:$16 sps:$4 sm:$0xff]  }
 0x339   :  { %3820 = vmatprep.subr.bf16.mxu0 %v5668_v2  ;;  %3943 = vmatprep.subr.bf16.mxu1 %v5671_v3  ;;  %v5732_v2 = vld [vmem:[#allocation14 + $0x40] sm:$0xff]  }
 0x33a   :  { %v5733_v3 = vld [vmem:[#allocation14 + $0xc0] sm:$0xff]  }
 0x33c   :  { %3821 = vmatpush1.bf16.msra.mxu0 %v5666_v4  ;;  %3944 = vmatpush1.bf16.msra.mxu1 %v5669_v5  ;;  %v5734_v4 = vld [vmem:[#allocation14] sm:$0xff]  }
 0x33d   :  { %3822 = vmatprep.subr.bf16.mxu0 %v5674_v47  ;;  %3945 = vmatprep.subr.bf16.mxu1 %v5677_v7  ;;  %v5735_v5 = vld [vmem:[#allocation14 + $0x80] sm:$0xff]   ;;  %v5736_v47 = vld [vmem:[#allocation14 + $0x48] sm:$0xff]  }
 0x33e   :  { %v4924_v11 = vpop.f32.mrb[16].mxu0  ;;  %v5737_v7 = vld [vmem:[#allocation14 + $0xc8] sm:$0xff]  }
 0x33f   :  { %v2755_v12 = vpop.f32.mrb[16].mxu1  ;;  %v4925_v14 = vpop.f32.mrb[17].mxu0 }
 0x340   :  { %v4926_v18 = vadd.f32 %v4925_v14, %v4924_v11  ;;  %v5009_v16 = vpop.f32.mrb[17].mxu1  ;;  %3823 = vmatpush1.bf16.msra.mxu0 %v5672_v13  ;;  %3946 = vmatpush1.bf16.msra.mxu1 %v5675_v19  ;;  %v4927_v25 = vpop.f32.mrb[18].mxu0  ;;  %v5738_v13 = vld [vmem:[#allocation14 + $0x8] sm:$0xff]   ;;  %v5743_v11 = vld [vmem:[#allocation14 + $0x90] sm:$0xff]   ;;  %v5745_v14 = vld [vmem:[#allocation14 + $0xd8] sm:$0xff]  }
 0x341   :  { %v2758_v15 = vpop.f32.mrb[18].mxu1  ;;  %v4928_v27 = vpop.f32.mrb[19].mxu0  ;;  %3824 = vmatprep.subr.bf16.mxu0 %v5680_v9  ;;  %3947 = vmatprep.subr.bf16.mxu1 %v5683_v10  ;;  %v5739_v19 = vld [vmem:[#allocation14 + $0x88] sm:$0xff]   ;;  %v5741_v9 = vld [vmem:[#allocation14 + $0xd0] sm:$0xff]   ;;  %v5748_v16 = vld [vmem:[#allocation14 + $0x60] sm:$0xff]  }
 0x342   :  { %v2716_v29 = vadd.f32 %v4926_v18, %v6290_v52  ;;  %v5010_v30 = vpop.f32.mrb[19].mxu1  ;;  %v5707_v52 = vld [vmem:[#allocation11 + $0x46c] ss:$16 sps:$4 sm:$0xff]   ;;  %v5742_v10 = vld [vmem:[#allocation14 + $0x10] sm:$0xff]   ;;  %v5749_v25 = vld [vmem:[#allocation14 + $0xe0] sm:$0xff]  }
 0x343   :  { %v5747_v18 = vld [vmem:[#allocation14 + $0x98] sm:$0xff]   ;;  %v5753_v15 = vld [vmem:[#allocation14 + $0xe8] sm:$0xff]   ;;  %v5757_v30 = vld [vmem:[#allocation14 + $0xf0] sm:$0xff]  }
 0x344   :  { %v6296_v31 = vadd.f32 %v2755_v12, %v2716_v29  ;;  %3825 = vmatpush1.bf16.msra.mxu0 %v5678_v17  ;;  %3948 = vmatpush1.bf16.msra.mxu1 %v5681_v53  ;;  %v5744_v12 = vld [vmem:[#allocation14 + $0x58] sm:$0xff]   ;;  %v5750_v53 = vld [vmem:[#allocation14 + $0x20] sm:$0xff]   ;;  %v5754_v27 = vld [vmem:[#allocation14 + $0x28] sm:$0xff]  }
 0x345   :  { %3835 = vmatprep.subr.bf16.mxu0 %v5686_v20  ;;  %3958 = vmatprep.subr.bf16.mxu1 %v5689_v41  ;;  %v5746_v17 = vld [vmem:[#allocation14 + $0x18] sm:$0xff]   ;;  %v5751_v20 = vld [vmem:[#allocation14 + $0xa0] sm:$0xff]   ;;  %v5755_v41 = vld [vmem:[#allocation14 + $0xa8] sm:$0xff]  }
 0x346   :  { %v2765_v1 = vmax.f32 %v6296_v31, 0.0  ;;  %v5756_v29 = vld [vmem:[#allocation14 + $0x70] sm:$0xff]  }
 0x347   :  { %3827 = vmatmul.mubr.bf16.vlgmr.msra.gmra.mrb[20].mxu0 %v2768_v34  ;;  %3950 = vmatmul.mubr.bf16.vlgmr.msra.gmra.mrb[20].mxu1 %v2768_v34  ;;  %v5758_v31 = vld [vmem:[#allocation14 + $0x30] sm:$0xff]   ;;  %v5761_v34 = vld [vmem:[#allocation14 + $0xf8] sm:$0xff]  }
 0x348   :  { %3836 = vmatpush1.bf16.msra.mxu0 %v5684_v32  ;;  %3959 = vmatpush1.bf16.msra.mxu1 %v5687_v33  ;;  %v2770_v6 = vpack.c.bf16 %v2765_v1, %v2765_v1  ;;  %v5759_v32 = vld [vmem:[#allocation14 + $0xb0] sm:$0xff]   ;;  %v5760_v33 = vld [vmem:[#allocation14 + $0x78] sm:$0xff]  }
 0x349   :  { %3837 = vmatprep.subr.bf16.mxu0 %v5692_v35  ;;  %3960 = vmatprep.subr.bf16.mxu1 %v5695_v36  ;;  %v5762_v35 = vld [vmem:[#allocation14 + $0x38] sm:$0xff]  }
 0x34a   :  { %3867 = vmatprep.mubr.bf16.mxu0 %v6013_v0  ;;  %3990 = vmatprep.mubr.bf16.mxu1 %v6013_v0  ;;  %v5711_v0 = vld [vmem:[#allocation11 + $0x488] ss:$16 sps:$4 sm:$0xff]   ;;  %v5763_v36 = vld [vmem:[#allocation14 + $0xb8] sm:$0xff]  }
 0x34c   :  { %3838 = vmatpush1.bf16.msra.mxu0 %v5690_v37  ;;  %3961 = vmatpush1.bf16.msra.mxu1 %v5693_v39  ;;  %v2931_v37 = vld [vmem:[#allocation13] sm:$0xf] }
 0x34d   :  { %3839 = vmatprep.subr.bf16.mxu0 %v5698_v40  ;;  %3962 = vmatprep.subr.bf16.mxu1 %v5701_v22  ;;  %v2936_v39 = vrot.slane %v2931_v37, %v6189_v24  ;;  %v2944_v40 = vrot.slane %v2931_v37, %v6226_v55  ;;  %v2940_v22 = vrot.slane %v2931_v37, %v6194_v26 }
 0x350   :  { %3840 = vmatpush1.bf16.msra.mxu0 %v5696_v45  ;;  %3963 = vmatpush1.bf16.msra.mxu1 %v5699_v51  ;;  %v2948_v45 = vrot.slane %v2931_v37, %v6199_v28 }
 0x351   :  { %3841 = vmatprep.subr.bf16.mxu0 %v5704_v23  ;;  %3964 = vmatprep.subr.bf16.mxu1 %v5707_v52 }
 0x354   :  { %3842 = vmatpush1.bf16.msra.mxu0 %v5702_v38  ;;  %3965 = vmatpush1.bf16.msra.mxu1 %v5705_v42 }
 0x355   :  { %3843 = vmatprep.subr.bf16.mxu0 %v5710_v43  ;;  %3966 = vmatprep.subr.bf16.mxu1 %v5713_v44 }
 0x358   :  { %3844 = vmatpush1.bf16.msra.mxu0 %v5708_v46  ;;  %3967 = vmatpush1.bf16.msra.mxu1 %v5711_v0 }
 0x359   :  { %3845 = vmatprep.subr.bf16.mxu0 %v5716_v48  ;;  %3968 = vmatprep.subr.bf16.mxu1 %v5719_v49 }
 0x35c   :  { %3846 = vmatpush1.bf16.msra.mxu0 %v5714_v50  ;;  %3969 = vmatpush1.bf16.msra.mxu1 %v5717_v54 }
 0x35d   :  { %3847 = vmatprep.subr.bf16.mxu0 %v5722_v56  ;;  %3970 = vmatprep.subr.bf16.mxu1 %v5725_v57 }
 0x360   :  { %3848 = vmatpush1.bf16.msra.mxu0 %v5720_v58  ;;  %3971 = vmatpush1.bf16.msra.mxu1 %v5723_v59 }
 0x361   :  { %3849 = vmatprep.subr.bf16.mxu0 %v5728_v60  ;;  %3972 = vmatprep.subr.bf16.mxu1 %v5731_v61  ;;  %v4828_v61 = vld [vmem:[#allocation16] ss:$0 sm:$0xff] }
 0x364   :  { %3850 = vmatpush1.bf16.msra.mxu0 %v5726_v62  ;;  %3973 = vmatpush1.bf16.msra.mxu1 %v5729_v63 }
 0x365   :  { %4939 = vmatprep.subr.bf16.mxu0 %v5732_v2  ;;  %4961 = vmatprep.subr.bf16.mxu1 %v5733_v3 }
 0x367   :  { %3868 = vmatmul.mubr.bf16.vlgmr.msra.gmra.mrb[20].mxu0 %v2770_v6  ;;  %3991 = vmatmul.mubr.bf16.vlgmr.msra.gmra.mrb[20].mxu1 %v2770_v6 }
 0x368   :  { %4940 = vmatpush3.bf16.msra.mxu0 %v5734_v4  ;;  %4962 = vmatpush3.bf16.msra.mxu1 %v5735_v5 }
 0x369   :  { %4941 = vmatprep.subr.bf16.mxu0 %v5736_v47  ;;  %4963 = vmatprep.subr.bf16.mxu1 %v5737_v7 }
 0x36c   :  { %4942 = vmatpush3.bf16.msra.mxu0 %v5738_v13  ;;  %4964 = vmatpush3.bf16.msra.mxu1 %v5739_v19 }
 0x36d   :  { %4943 = vmatprep.subr.bf16.mxu0 %v5740_v8  ;;  %4965 = vmatprep.subr.bf16.mxu1 %v5741_v9 }
 0x370   :  { %4944 = vmatpush3.bf16.msra.mxu0 %v5742_v10  ;;  %4966 = vmatpush3.bf16.msra.mxu1 %v5743_v11 }
 0x371   :  { %4945 = vmatprep.subr.bf16.mxu0 %v5744_v12  ;;  %4967 = vmatprep.subr.bf16.mxu1 %v5745_v14 }
 0x374   :  { %4946 = vmatpush3.bf16.msra.mxu0 %v5746_v17  ;;  %4968 = vmatpush3.bf16.msra.mxu1 %v5747_v18 }
 0x375   :  { %4947 = vmatprep.subr.bf16.mxu0 %v5748_v16  ;;  %4969 = vmatprep.subr.bf16.mxu1 %v5749_v25 }
 0x378   :  { %4948 = vmatpush3.bf16.msra.mxu0 %v5750_v53  ;;  %4970 = vmatpush3.bf16.msra.mxu1 %v5751_v20 }
 0x379   :  { %4949 = vmatprep.subr.bf16.mxu0 %v5752_v21  ;;  %4971 = vmatprep.subr.bf16.mxu1 %v5753_v15 }
 0x37c   :  { %4950 = vmatpush3.bf16.msra.mxu0 %v5754_v27  ;;  %4972 = vmatpush3.bf16.msra.mxu1 %v5755_v41 }
 0x37d   :  { %4951 = vmatprep.subr.bf16.mxu0 %v5756_v29  ;;  %4973 = vmatprep.subr.bf16.mxu1 %v5757_v30 }
 0x380   :  { %4952 = vmatpush3.bf16.msra.mxu0 %v5758_v31  ;;  %4974 = vmatpush3.bf16.msra.mxu1 %v5759_v32 }
 0x381   :  { %4953 = vmatprep.subr.bf16.mxu0 %v5760_v33  ;;  %4975 = vmatprep.subr.bf16.mxu1 %v5761_v34 }
 0x384   :  { %4954 = vmatpush3.bf16.msra.mxu0 %v5762_v35  ;;  %4976 = vmatpush3.bf16.msra.mxu1 %v5763_v36 }
 0x43a   :  { %v3869_v51 = vpop.f32.mrb[20].mxu0  ;;  %v3992_v23 = vpop.f32.mrb[20].mxu1 }
 0x43b   :  { %v5015_v52 = vadd.f32 %v3869_v51, %v2936_v39  ;;  %v5017_v38 = vadd.f32 %v3992_v23, %v2944_v40  ;;  %v3871_v42 = vpop.f32.mrb[21].mxu0  ;;  %v3994_v43 = vpop.f32.mrb[21].mxu1 }
 0x43c   :  { %v5016_v44 = vadd.f32 %v3871_v42, %v2940_v22  ;;  %v5018_v46 = vadd.f32 %v3994_v43, %v2948_v45  ;;  %v3873_v0 = vpop.f32.mrb[22].mxu0  ;;  %v3996_v48 = vpop.f32.mrb[22].mxu1 }
 0x43d   :  { %v3999_v49 = vmax.f32 %v5015_v52, 0.0  ;;  %v4001_v50 = vmax.f32 %v5017_v38, 0.0  ;;  %v3874_v54 = vpop.f32.mrb[23].mxu0  ;;  %v3997_v24 = vpop.f32.mrb[23].mxu1 }
 0x43e   :  { %v4000_v56 = vmax.f32 %v5016_v44, 0.0  ;;  %v4002_v55 = vmax.f32 %v5018_v46, 0.0 }
 0x43f   :  { %v4003_v58 = vpack.c.bf16 %v3999_v49, %v3999_v49  ;;  %v4005_v28 = vpack.c.bf16 %v4001_v50, %v4001_v50 }
 0x440   :  { %v4004_v57 = vpack.c.bf16 %v4000_v56, %v4000_v56  ;;  %v4006_v26 = vpack.c.bf16 %v4002_v55, %v4002_v55 }
 0x442   :  { %4302 = vmatprep.mubr.bf16.mxu0 %v4004_v57  ;;  %4342 = vmatprep.mubr.bf16.mxu1 %v4006_v26 }
 0x443   :  { %4303 = vmatmul.mubr.bf16.vlgmr.msra.gmra.mrb[24].mxu0 %v4003_v58  ;;  %4343 = vmatmul.mubr.bf16.vlgmr.msra.gmra.mrb[24].mxu1 %v4005_v28 }
 0x516   :  { %v4955_v59 = vpop.f32.mrb[24].mxu0  ;;  %v4977_v60 = vpop.f32.mrb[24].mxu1 }
 0x517   :  { %v4956_v62 = vpop.f32.mrb[25].mxu0  ;;  %v4978_v63 = vpop.f32.mrb[25].mxu1 }
 0x518   :  { %v4957_v1 = vadd.f32 %v4956_v62, %v4955_v59  ;;  %v4979_v2 = vadd.f32 %v4978_v63, %v4977_v60  ;;  %v4958_v3 = vpop.f32.mrb[26].mxu0  ;;  %v4980_v4 = vpop.f32.mrb[26].mxu1 }
 0x519   :  { %v4959_v5 = vpop.f32.mrb[27].mxu0  ;;  %v4981_v6 = vpop.f32.mrb[27].mxu1 }
 0x51a   :  { %v4305_v47 = vadd.f32 %v4957_v1, %v4828_v61 }
 0x51c   :  { %v4345_v7 = vadd.f32 %v4979_v2, %v4305_v47 }
 0x51e   :  { %4350 = vst [vmem:[#allocation17] sm:$0x3] %v4345_v7 }
 0x51f   :  { %5973 = shalt.err (!%p5970_p6)
}
 0x520   :  { %s5974_s7 = scalar_lea.hbm %s6326_s9, 32 }
 0x521   :  { %p5975_p7 = scmp.ne.s32.totalorder %s6326_s9, %s5974_s7  ;;  %p5978_p8 = scmp.lt.u32.totalorder %s5974_s7, %s6326_s9 }
 0x523   :  { %p5980_p9 = pnand %p5978_p8, %p5975_p7 }
 0x525   :  { %5983 = shalt.err (!%p5980_p9)
}
 0x526   :  { %4360 = dma.vmem_to_hbm [thread:$0]  %s4358_s27, 32, %s6326_s9, [#allocation4]  }
 0x527   :  { %5994 = dma.done.wait [#allocation4], 32  }
 0x528   :  { %5995 = vsyncadd [#allocation4], 4294967264 }
 0x529   :  { %4364 = vsyncpa [#allocation3], 1 }
 0x52a   :  { %4365 = vsyncpa [#allocation6], 1 }
 0x52b   :  { %4366 = vsyncpa [#allocation9], 1 }
 0x52c   :  { %4367 = vsyncpa [#allocation12], 1 }
 0x52d   :  { %4368 = vsyncpa [#allocation15], 1 }
 0x52e   :  { %4369 = vsyncpa [#allocation4], 1 }

</bundles_post_ra>
